<compile_context>
chip_gen: v7x
topology: tpu7x:2x2x1
jax: 0.10.0
libtpu: 0.0.40
codegen_flags: <defaults>
</compile_context>

<pallas_src>
import functools

import jax
import jax.numpy as jnp
from jax import lax
from jax.experimental import pallas as pl
from jax.experimental.pallas import tpu as pltpu

N_EMBED = 64
N_HEAD = 6
HEAD_SIZE = N_EMBED // N_HEAD          # 10
CAT_DIM = N_HEAD * HEAD_SIZE           # 60
FF_DIM = 4 * N_EMBED                   # 256
LN_EPS = 1e-5


def _layernorm(h, w, b):
    mu = jnp.mean(h, axis=-1, keepdims=True)
    var = jnp.mean((h - mu) ** 2, axis=-1, keepdims=True)
    return (h - mu) * lax.rsqrt(var + LN_EPS) * w + b


def block_kernel(x_ref, wqkv_ref, wproj_ref, w1_ref, w2_ref, vec_ref, out_ref,
                 *, compute_dtype):
    Bb, T, C = x_ref.shape
    M = Bb * T

    x = x_ref[...].reshape(M, C)                       # (M, C) f32 rows

    vec = vec_ref[...]                                 # (8, FF_DIM) packed small params
    ln1_w, ln1_b = vec[0:1, :C], vec[1:2, :C]
    ln2_w, ln2_b = vec[2:3, :C], vec[3:4, :C]
    b_proj, b2 = vec[4:5, :C], vec[5:6, :C]
    b1 = vec[6:7, :]                                   # (1, FF_DIM)

    # ---------------- self-attention branch ----------------
    h1 = _layernorm(x, ln1_w, ln1_b)                   # f32, (M, C)
    # one fused QKV matmul over all Bb*T rows (N = 3*60 = 180 lanes)
    qkv = jnp.dot(h1.astype(compute_dtype), wqkv_ref[...].astype(compute_dtype),
                  preferred_element_type=jnp.float32)  # (M, 3*CAT_DIM)
    qkv = qkv.reshape(Bb, T, 3 * CAT_DIM)

    scale = C ** (-0.5)                                # matches torch Head.forward (n_embed scale)
    row = lax.broadcasted_iota(jnp.int32, (1, T, T), 1)
    col = lax.broadcasted_iota(jnp.int32, (1, T, T), 2)
    causal = col <= row                                # built once per grid step

    sa = jnp.zeros((M, C), jnp.float32)
    for h in range(N_HEAD):                            # static unroll over heads
        q = qkv[:, :, h * HEAD_SIZE:(h + 1) * HEAD_SIZE]
        k = qkv[:, :, CAT_DIM + h * HEAD_SIZE:CAT_DIM + (h + 1) * HEAD_SIZE]
        v = qkv[:, :, 2 * CAT_DIM + h * HEAD_SIZE:2 * CAT_DIM + (h + 1) * HEAD_SIZE]
        s = jnp.einsum("bqd,bkd->bqk",
                       q.astype(compute_dtype), k.astype(compute_dtype),
                       preferred_element_type=jnp.float32) * scale
        s = jnp.where(causal, s, -1e30)                # finite mask (robust vs -inf)
        s = s - jnp.max(s, axis=-1, keepdims=True)
        p = jnp.exp(s)
        p = p * pl.reciprocal(jnp.sum(p, axis=-1, keepdims=True), approx=True)
        o = jnp.einsum("bqk,bkd->bqd",
                       p.astype(compute_dtype), v.astype(compute_dtype),
                       preferred_element_type=jnp.float32)           # (Bb, T, HS)
        # per-head output projection accumulated into sa (no lane-axis concat)
        sa = sa + jnp.dot(o.reshape(M, HEAD_SIZE).astype(compute_dtype),
                          wproj_ref[h].astype(compute_dtype),
                          preferred_element_type=jnp.float32)
    x1 = x + sa + b_proj

    # ---------------- feed-forward branch ----------------
    h2 = _layernorm(x1, ln2_w, ln2_b)
    ff = jnp.dot(h2.astype(compute_dtype), w1_ref[...].astype(compute_dtype),
                 preferred_element_type=jnp.float32) + b1
    ff = jnp.maximum(ff, 0.0)                                          # ReLU
    ff = jnp.dot(ff.astype(compute_dtype), w2_ref[...].astype(compute_dtype),
                 preferred_element_type=jnp.float32) + b2

    out_ref[...] = (x1 + ff).reshape(Bb, T, C)


def pack_params(p):
    """Repack the per-head / per-layer params into a few contiguous slabs."""
    def cat_heads(w):                       # (NH, C, HS) -> (C, NH*HS), head-major cols
        return jnp.transpose(w, (1, 0, 2)).reshape(N_EMBED, CAT_DIM)

    wqkv = jnp.concatenate(
        [cat_heads(p["wq"]), cat_heads(p["wk"]), cat_heads(p["wv"])], axis=1)   # (C, 180)
    wproj = p["wproj"].reshape(N_HEAD, HEAD_SIZE, N_EMBED)                      # (6, 10, C)

    vec = jnp.zeros((8, FF_DIM), jnp.float32)                                   # (8, 256) slab
    vec = vec.at[0, :N_EMBED].set(p["ln1_w"][0])
    vec = vec.at[1, :N_EMBED].set(p["ln1_b"][0])
    vec = vec.at[2, :N_EMBED].set(p["ln2_w"][0])
    vec = vec.at[3, :N_EMBED].set(p["ln2_b"][0])
    vec = vec.at[4, :N_EMBED].set(p["bproj"][0])
    vec = vec.at[5, :N_EMBED].set(p["b2"][0])
    vec = vec.at[6, :].set(p["b1"][0])
    return wqkv, wproj, p["w1"], p["w2"], vec


def _pick_batch_block(B, max_bb=256):
    """Largest divisor of B that is <= max_bb, preferring >= 4 grid steps when
    the batch allows it (keeps >=2 in-flight steps per TensorCore on v7x);
    cap at 256 keeps the (Bb,8,64) f32 in/out blocks well inside 64 MiB VMEM."""
    target = min(max_bb, max(1, B // 4)) if B >= 8 else min(B, max_bb)
    bb = 1
    for d in range(1, min(B, target) + 1):
        if B % d == 0:
            bb = d
    return bb


def block_forward(x, params, *, use_bf16=True, max_batch_block=256):
    """x: (B, T, C) float32. params: dict of natural-layout weights."""
    B, T, C = x.shape
    assert C == N_EMBED
    wqkv, wproj, w1, w2, vec = pack_params(params)
    Bb = _pick_batch_block(B, max_batch_block)
    compute_dtype = jnp.bfloat16 if use_bf16 else jnp.float32

    def full(arr):
        return pl.BlockSpec(arr.shape, lambda i, nd=arr.ndim: (0,) * nd)

    kernel = functools.partial(block_kernel, compute_dtype=compute_dtype)

    return pl.pallas_call(
        kernel,
        out_shape=jax.ShapeDtypeStruct((B, T, C), jnp.float32),
        grid=(B // Bb,),
        in_specs=[pl.BlockSpec((Bb, T, C), lambda i: (i, 0, 0)),
                  full(wqkv), full(wproj), full(w1), full(w2), full(vec)],
        out_specs=pl.BlockSpec((Bb, T, C), lambda i: (i, 0, 0)),
        compiler_params=pltpu.CompilerParams(
            dimension_semantics=("parallel",)),
    )(x, wqkv, wproj, w1, w2, vec)


def block_reference(x, p):
    """Pure-JAX reference matching the PyTorch Block forward (f32)."""
    h1 = _layernorm(x, p["ln1_w"][0], p["ln1_b"][0])
    T = x.shape[1]
    causal = jnp.tril(jnp.ones((T, T), dtype=bool))
    scale = x.shape[-1] ** (-0.5)
    outs = []
    for h in range(N_HEAD):
        q = h1 @ p["wq"][h]
        k = h1 @ p["wk"][h]
        v = h1 @ p["wv"][h]
        s = jnp.einsum("btd,bsd->bts", q, k) * scale
        s = jnp.where(causal[None], s, -jnp.inf)
        w = jax.nn.softmax(s, axis=-1)
        outs.append(jnp.einsum("bts,bsd->btd", w, v))
    sa = jnp.concatenate(outs, axis=-1) @ p["wproj"] + p["bproj"][0]
    x1 = x + sa
    h2 = _layernorm(x1, p["ln2_w"][0], p["ln2_b"][0])
    ff = jnp.maximum(h2 @ p["w1"] + p["b1"][0], 0.0) @ p["w2"] + p["b2"][0]
    return x1 + ff


def init_params(key):
    ks = jax.random.split(key, 10)
    s = 0.02
    return {
        "ln1_w": jnp.ones((1, N_EMBED), jnp.float32),
        "ln1_b": jnp.zeros((1, N_EMBED), jnp.float32),
        # per-head projection weights, stored as (n_head, in, out)
        "wq": s * jax.random.normal(ks[0], (N_HEAD, N_EMBED, HEAD_SIZE), jnp.float32),
        "wk": s * jax.random.normal(ks[1], (N_HEAD, N_EMBED, HEAD_SIZE), jnp.float32),
        "wv": s * jax.random.normal(ks[2], (N_HEAD, N_EMBED, HEAD_SIZE), jnp.float32),
        # output projection: (num_heads*head_size, n_embed) i.e. (in, out)
        "wproj": s * jax.random.normal(ks[3], (CAT_DIM, N_EMBED), jnp.float32),
        "bproj": s * jax.random.normal(ks[4], (1, N_EMBED), jnp.float32),
        "ln2_w": jnp.ones((1, N_EMBED), jnp.float32),
        "ln2_b": jnp.zeros((1, N_EMBED), jnp.float32),
        # feed-forward: Linear(64 -> 256), ReLU, Linear(256 -> 64), stored (in, out)
        "w1": s * jax.random.normal(ks[5], (N_EMBED, FF_DIM), jnp.float32),
        "b1": s * jax.random.normal(ks[6], (1, FF_DIM), jnp.float32),
        "w2": s * jax.random.normal(ks[7], (FF_DIM, N_EMBED), jnp.float32),
        "b2": s * jax.random.normal(ks[8], (1, N_EMBED), jnp.float32),
    }


if __name__ == "__main__":
    key = jax.random.PRNGKey(0)
    kp, kx = jax.random.split(key)
    params = init_params(kp)

    B, T = 2, 8
    x = jax.random.normal(kx, (B, T, N_EMBED), jnp.float32)

    ref = block_reference(x, params)

    # f32-MXU path: tight numerical check against the pure-JAX reference.
    out_f32 = jax.block_until_ready(block_forward(x, params, use_bf16=False))
    assert out_f32.shape == (B, T, N_EMBED)
    assert jnp.allclose(out_f32, ref, atol=2e-3, rtol=2e-3), "f32 kernel mismatch vs. reference"

    # bf16-MXU path (default / fast path on v6e & v7x, f32 accumulation).
    out_bf16 = jax.block_until_ready(block_forward(x, params, use_bf16=True))
    assert jnp.allclose(out_bf16, ref, atol=2e-2, rtol=2e-2), "bf16 kernel mismatch vs. reference"

    print("KERNEL_OK")
</pallas_src>

<mosaic_0001>
module attributes {stable_mosaic.version = 11 : i64} {
  func.func @block_kernel(%arg0: i32, %arg1: memref<2x8x64xf32, #tpu.memory_space<vmem>>, %arg2: memref<64x180xf32, #tpu.memory_space<vmem>>, %arg3: memref<6x10x64xf32, #tpu.memory_space<vmem>>, %arg4: memref<64x256xf32, #tpu.memory_space<vmem>>, %arg5: memref<256x64xf32, #tpu.memory_space<vmem>>, %arg6: memref<8x256xf32, #tpu.memory_space<vmem>>, %arg7: memref<2x8x64xf32, #tpu.memory_space<vmem>>) attributes {dimension_semantics = [#tpu.dimension_semantics<parallel>], iteration_bounds = array<i64: 1>, scalar_prefetch = 0 : i64, scratch_operands = 0 : i64, tpu.core_type = #tpu.core_type<tc>, window_params = [{transform_indices = @transform_0, window_bounds = array<i64: 2, 8, 64>}, {pipeline_mode = #tpu.pipeline_mode<synchronous>, transform_indices = @transform_1, window_bounds = array<i64: 64, 180>}, {pipeline_mode = #tpu.pipeline_mode<synchronous>, transform_indices = @transform_2, window_bounds = array<i64: 6, 10, 64>}, {pipeline_mode = #tpu.pipeline_mode<synchronous>, transform_indices = @transform_3, window_bounds = array<i64: 64, 256>}, {pipeline_mode = #tpu.pipeline_mode<synchronous>, transform_indices = @transform_4, window_bounds = array<i64: 256, 64>}, {pipeline_mode = #tpu.pipeline_mode<synchronous>, transform_indices = @transform_5, window_bounds = array<i64: 8, 256>}, {transform_indices = @transform_6, window_bounds = array<i64: 2, 8, 64>}]} {
    %c0 = arith.constant 0 : index
    %c0_0 = arith.constant 0 : index
    %c0_1 = arith.constant 0 : index
    %0 = vector.load %arg1[%c0, %c0_0, %c0_1] : memref<2x8x64xf32, #tpu.memory_space<vmem>>, vector<2x8x64xf32>
    %1 = vector.shape_cast %0 : vector<2x8x64xf32> to vector<16x64xf32>
    %c0_2 = arith.constant 0 : index
    %c0_3 = arith.constant 0 : index
    %2 = vector.load %arg6[%c0_2, %c0_3] : memref<8x256xf32, #tpu.memory_space<vmem>>, vector<8x256xf32>
    %3 = vector.extract_strided_slice %2 {offsets = [0, 0], sizes = [1, 64], strides = [1, 1]} : vector<8x256xf32> to vector<1x64xf32>
    %4 = vector.extract_strided_slice %2 {offsets = [1, 0], sizes = [1, 64], strides = [1, 1]} : vector<8x256xf32> to vector<1x64xf32>
    %5 = vector.extract_strided_slice %2 {offsets = [2, 0], sizes = [1, 64], strides = [1, 1]} : vector<8x256xf32> to vector<1x64xf32>
    %6 = vector.extract_strided_slice %2 {offsets = [3, 0], sizes = [1, 64], strides = [1, 1]} : vector<8x256xf32> to vector<1x64xf32>
    %7 = vector.extract_strided_slice %2 {offsets = [4, 0], sizes = [1, 64], strides = [1, 1]} : vector<8x256xf32> to vector<1x64xf32>
    %8 = vector.extract_strided_slice %2 {offsets = [5, 0], sizes = [1, 64], strides = [1, 1]} : vector<8x256xf32> to vector<1x64xf32>
    %9 = vector.extract_strided_slice %2 {offsets = [6, 0], sizes = [1, 256], strides = [1, 1]} : vector<8x256xf32> to vector<1x256xf32>
    %cst = arith.constant dense<0.000000e+00> : vector<16xf32>
    %10 = vector.multi_reduction <add>, %1, %cst [1] : vector<16x64xf32> to vector<16xf32>
    %11 = vector.shape_cast %10 : vector<16xf32> to vector<16x1xf32>
    %cst_4 = arith.constant 6.400000e+01 : f32
    %12 = vector.broadcast %cst_4 : f32 to vector<16x1xf32>
    %13 = arith.divf %11, %12 : vector<16x1xf32>
    %14 = vector.broadcast %13 : vector<16x1xf32> to vector<16x64xf32>
    %15 = arith.subf %1, %14 : vector<16x64xf32>
    %16 = arith.mulf %15, %15 : vector<16x64xf32>
    %cst_5 = arith.constant dense<0.000000e+00> : vector<16xf32>
    %17 = vector.multi_reduction <add>, %16, %cst_5 [1] : vector<16x64xf32> to vector<16xf32>
    %18 = vector.shape_cast %17 : vector<16xf32> to vector<16x1xf32>
    %cst_6 = arith.constant 6.400000e+01 : f32
    %19 = vector.broadcast %cst_6 : f32 to vector<16x1xf32>
    %20 = arith.divf %18, %19 : vector<16x1xf32>
    %21 = vector.broadcast %13 : vector<16x1xf32> to vector<16x64xf32>
    %22 = arith.subf %1, %21 : vector<16x64xf32>
    %cst_7 = arith.constant 9.99999974E-6 : f32
    %23 = vector.broadcast %cst_7 : f32 to vector<16x1xf32>
    %24 = arith.addf %20, %23 : vector<16x1xf32>
    %25 = math.rsqrt %24 : vector<16x1xf32>
    %26 = vector.broadcast %25 : vector<16x1xf32> to vector<16x64xf32>
    %27 = arith.mulf %22, %26 : vector<16x64xf32>
    %28 = vector.broadcast %3 : vector<1x64xf32> to vector<16x64xf32>
    %29 = arith.mulf %27, %28 : vector<16x64xf32>
    %30 = vector.broadcast %4 : vector<1x64xf32> to vector<16x64xf32>
    %31 = arith.addf %29, %30 : vector<16x64xf32>
    %c0_8 = arith.constant 0 : index
    %c0_9 = arith.constant 0 : index
    %32 = vector.load %arg2[%c0_8, %c0_9] : memref<64x180xf32, #tpu.memory_space<vmem>>, vector<64x180xf32>
    %cst_10 = arith.constant dense<0.000000e+00> : vector<16x180xf32>
    %33 = tpu.matmul %31, %32, %cst_10 {dimension_numbers = #tpu.dot_dimension_numbers<[1], [0], [0], [1], [0, 0, 1, 1], [], []>} : vector<16x64xf32>, vector<64x180xf32>, vector<16x180xf32> -> vector<16x180xf32>
    %34 = vector.shape_cast %33 : vector<16x180xf32> to vector<2x8x180xf32>
    %35 = tpu.iota {dimensions = array<i32: 1>} : vector<1x8x8xi32>
    %36 = tpu.iota {dimensions = array<i32: 2>} : vector<1x8x8xi32>
    %37 = arith.cmpi sle, %36, %35 : vector<1x8x8xi32>
    %cst_11 = arith.constant 0.000000e+00 : f32
    %38 = vector.broadcast %cst_11 : f32 to vector<16x64xf32>
    %39 = vector.extract_strided_slice %34 {offsets = [0, 0, 0], sizes = [2, 8, 10], strides = [1, 1, 1]} : vector<2x8x180xf32> to vector<2x8x10xf32>
    %40 = vector.extract_strided_slice %34 {offsets = [0, 0, 60], sizes = [2, 8, 10], strides = [1, 1, 1]} : vector<2x8x180xf32> to vector<2x8x10xf32>
    %41 = vector.extract_strided_slice %34 {offsets = [0, 0, 120], sizes = [2, 8, 10], strides = [1, 1, 1]} : vector<2x8x180xf32> to vector<2x8x10xf32>
    "tpu.trace_start"() <{level = 10 : i32, message = "bqd,bkd->bqk"}> : () -> ()
    %cst_12 = arith.constant dense<0.000000e+00> : vector<2x8x8xf32>
    %42 = tpu.matmul %39, %40, %cst_12 {dimension_numbers = #tpu.dot_dimension_numbers<[2], [2], [1], [1], [0, 0, 0, 1, 1, 1], [0], [0]>} : vector<2x8x10xf32>, vector<2x8x10xf32>, vector<2x8x8xf32> -> vector<2x8x8xf32>
    "tpu.trace_stop"() : () -> ()
    %cst_13 = arith.constant 1.250000e-01 : f32
    %43 = vector.broadcast %cst_13 : f32 to vector<2x8x8xf32>
    %44 = arith.mulf %42, %43 : vector<2x8x8xf32>
    %cst_14 = arith.constant -1.000000e+30 : f32
    %45 = vector.shape_cast %37 : vector<1x8x8xi1> to vector<1x8x8xi1>
    %46 = vector.broadcast %45 : vector<1x8x8xi1> to vector<2x8x8xi1>
    %47 = vector.broadcast %cst_14 : f32 to vector<2x8x8xf32>
    %48 = arith.select %46, %44, %47 : vector<2x8x8xi1>, vector<2x8x8xf32>
    %cst_15 = arith.constant dense<0xFF800000> : vector<2x8xf32>
    %49 = vector.multi_reduction <maximumf>, %48, %cst_15 [2] : vector<2x8x8xf32> to vector<2x8xf32>
    %50 = vector.shape_cast %49 : vector<2x8xf32> to vector<2x8x1xf32>
    %51 = vector.broadcast %50 : vector<2x8x1xf32> to vector<2x8x8xf32>
    %52 = arith.subf %48, %51 : vector<2x8x8xf32>
    %53 = math.exp %52 : vector<2x8x8xf32>
    %cst_16 = arith.constant dense<0.000000e+00> : vector<2x8xf32>
    %54 = vector.multi_reduction <add>, %53, %cst_16 [2] : vector<2x8x8xf32> to vector<2x8xf32>
    %55 = vector.shape_cast %54 : vector<2x8xf32> to vector<2x8x1xf32>
    %56 = tpu.reciprocal %55 {approx = true} : vector<2x8x1xf32> -> vector<2x8x1xf32>
    %57 = vector.broadcast %56 : vector<2x8x1xf32> to vector<2x8x8xf32>
    %58 = arith.mulf %53, %57 : vector<2x8x8xf32>
    "tpu.trace_start"() <{level = 10 : i32, message = "bqk,bkd->bqd"}> : () -> ()
    %cst_17 = arith.constant dense<0.000000e+00> : vector<2x8x10xf32>
    %59 = tpu.matmul %58, %41, %cst_17 {dimension_numbers = #tpu.dot_dimension_numbers<[2], [1], [1], [2], [0, 0, 0, 1, 1, 2], [0], [0]>} : vector<2x8x8xf32>, vector<2x8x10xf32>, vector<2x8x10xf32> -> vector<2x8x10xf32>
    "tpu.trace_stop"() : () -> ()
    %60 = vector.shape_cast %59 : vector<2x8x10xf32> to vector<16x10xf32>
    %c0_18 = arith.constant 0 : index
    %c0_19 = arith.constant 0 : index
    %c0_20 = arith.constant 0 : index
    %61 = vector.load %arg3[%c0_18, %c0_19, %c0_20] : memref<6x10x64xf32, #tpu.memory_space<vmem>>, vector<1x10x64xf32>
    %62 = vector.shape_cast %61 : vector<1x10x64xf32> to vector<10x64xf32>
    %cst_21 = arith.constant dense<0.000000e+00> : vector<16x64xf32>
    %63 = tpu.matmul %60, %62, %cst_21 {dimension_numbers = #tpu.dot_dimension_numbers<[1], [0], [0], [1], [0, 0, 1, 1], [], []>} : vector<16x10xf32>, vector<10x64xf32>, vector<16x64xf32> -> vector<16x64xf32>
    %64 = arith.addf %38, %63 : vector<16x64xf32>
    %65 = vector.extract_strided_slice %34 {offsets = [0, 0, 10], sizes = [2, 8, 10], strides = [1, 1, 1]} : vector<2x8x180xf32> to vector<2x8x10xf32>
    %66 = vector.extract_strided_slice %34 {offsets = [0, 0, 70], sizes = [2, 8, 10], strides = [1, 1, 1]} : vector<2x8x180xf32> to vector<2x8x10xf32>
    %67 = vector.extract_strided_slice %34 {offsets = [0, 0, 130], sizes = [2, 8, 10], strides = [1, 1, 1]} : vector<2x8x180xf32> to vector<2x8x10xf32>
    "tpu.trace_start"() <{level = 10 : i32, message = "bqd,bkd->bqk"}> : () -> ()
    %cst_22 = arith.constant dense<0.000000e+00> : vector<2x8x8xf32>
    %68 = tpu.matmul %65, %66, %cst_22 {dimension_numbers = #tpu.dot_dimension_numbers<[2], [2], [1], [1], [0, 0, 0, 1, 1, 1], [0], [0]>} : vector<2x8x10xf32>, vector<2x8x10xf32>, vector<2x8x8xf32> -> vector<2x8x8xf32>
    "tpu.trace_stop"() : () -> ()
    %cst_23 = arith.constant 1.250000e-01 : f32
    %69 = vector.broadcast %cst_23 : f32 to vector<2x8x8xf32>
    %70 = arith.mulf %68, %69 : vector<2x8x8xf32>
    %cst_24 = arith.constant -1.000000e+30 : f32
    %71 = vector.shape_cast %37 : vector<1x8x8xi1> to vector<1x8x8xi1>
    %72 = vector.broadcast %71 : vector<1x8x8xi1> to vector<2x8x8xi1>
    %73 = vector.broadcast %cst_24 : f32 to vector<2x8x8xf32>
    %74 = arith.select %72, %70, %73 : vector<2x8x8xi1>, vector<2x8x8xf32>
    %cst_25 = arith.constant dense<0xFF800000> : vector<2x8xf32>
    %75 = vector.multi_reduction <maximumf>, %74, %cst_25 [2] : vector<2x8x8xf32> to vector<2x8xf32>
    %76 = vector.shape_cast %75 : vector<2x8xf32> to vector<2x8x1xf32>
    %77 = vector.broadcast %76 : vector<2x8x1xf32> to vector<2x8x8xf32>
    %78 = arith.subf %74, %77 : vector<2x8x8xf32>
    %79 = math.exp %78 : vector<2x8x8xf32>
    %cst_26 = arith.constant dense<0.000000e+00> : vector<2x8xf32>
    %80 = vector.multi_reduction <add>, %79, %cst_26 [2] : vector<2x8x8xf32> to vector<2x8xf32>
    %81 = vector.shape_cast %80 : vector<2x8xf32> to vector<2x8x1xf32>
    %82 = tpu.reciprocal %81 {approx = true} : vector<2x8x1xf32> -> vector<2x8x1xf32>
    %83 = vector.broadcast %82 : vector<2x8x1xf32> to vector<2x8x8xf32>
    %84 = arith.mulf %79, %83 : vector<2x8x8xf32>
    "tpu.trace_start"() <{level = 10 : i32, message = "bqk,bkd->bqd"}> : () -> ()
    %cst_27 = arith.constant dense<0.000000e+00> : vector<2x8x10xf32>
    %85 = tpu.matmul %84, %67, %cst_27 {dimension_numbers = #tpu.dot_dimension_numbers<[2], [1], [1], [2], [0, 0, 0, 1, 1, 2], [0], [0]>} : vector<2x8x8xf32>, vector<2x8x10xf32>, vector<2x8x10xf32> -> vector<2x8x10xf32>
    "tpu.trace_stop"() : () -> ()
    %86 = vector.shape_cast %85 : vector<2x8x10xf32> to vector<16x10xf32>
    %c1 = arith.constant 1 : index
    %c0_28 = arith.constant 0 : index
    %c0_29 = arith.constant 0 : index
    %87 = vector.load %arg3[%c1, %c0_28, %c0_29] : memref<6x10x64xf32, #tpu.memory_space<vmem>>, vector<1x10x64xf32>
    %88 = vector.shape_cast %87 : vector<1x10x64xf32> to vector<10x64xf32>
    %cst_30 = arith.constant dense<0.000000e+00> : vector<16x64xf32>
    %89 = tpu.matmul %86, %88, %cst_30 {dimension_numbers = #tpu.dot_dimension_numbers<[1], [0], [0], [1], [0, 0, 1, 1], [], []>} : vector<16x10xf32>, vector<10x64xf32>, vector<16x64xf32> -> vector<16x64xf32>
    %90 = arith.addf %64, %89 : vector<16x64xf32>
    %91 = vector.extract_strided_slice %34 {offsets = [0, 0, 20], sizes = [2, 8, 10], strides = [1, 1, 1]} : vector<2x8x180xf32> to vector<2x8x10xf32>
    %92 = vector.extract_strided_slice %34 {offsets = [0, 0, 80], sizes = [2, 8, 10], strides = [1, 1, 1]} : vector<2x8x180xf32> to vector<2x8x10xf32>
    %93 = vector.extract_strided_slice %34 {offsets = [0, 0, 140], sizes = [2, 8, 10], strides = [1, 1, 1]} : vector<2x8x180xf32> to vector<2x8x10xf32>
    "tpu.trace_start"() <{level = 10 : i32, message = "bqd,bkd->bqk"}> : () -> ()
    %cst_31 = arith.constant dense<0.000000e+00> : vector<2x8x8xf32>
    %94 = tpu.matmul %91, %92, %cst_31 {dimension_numbers = #tpu.dot_dimension_numbers<[2], [2], [1], [1], [0, 0, 0, 1, 1, 1], [0], [0]>} : vector<2x8x10xf32>, vector<2x8x10xf32>, vector<2x8x8xf32> -> vector<2x8x8xf32>
    "tpu.trace_stop"() : () -> ()
    %cst_32 = arith.constant 1.250000e-01 : f32
    %95 = vector.broadcast %cst_32 : f32 to vector<2x8x8xf32>
    %96 = arith.mulf %94, %95 : vector<2x8x8xf32>
    %cst_33 = arith.constant -1.000000e+30 : f32
    %97 = vector.shape_cast %37 : vector<1x8x8xi1> to vector<1x8x8xi1>
    %98 = vector.broadcast %97 : vector<1x8x8xi1> to vector<2x8x8xi1>
    %99 = vector.broadcast %cst_33 : f32 to vector<2x8x8xf32>
    %100 = arith.select %98, %96, %99 : vector<2x8x8xi1>, vector<2x8x8xf32>
    %cst_34 = arith.constant dense<0xFF800000> : vector<2x8xf32>
    %101 = vector.multi_reduction <maximumf>, %100, %cst_34 [2] : vector<2x8x8xf32> to vector<2x8xf32>
    %102 = vector.shape_cast %101 : vector<2x8xf32> to vector<2x8x1xf32>
    %103 = vector.broadcast %102 : vector<2x8x1xf32> to vector<2x8x8xf32>
    %104 = arith.subf %100, %103 : vector<2x8x8xf32>
    %105 = math.exp %104 : vector<2x8x8xf32>
    %cst_35 = arith.constant dense<0.000000e+00> : vector<2x8xf32>
    %106 = vector.multi_reduction <add>, %105, %cst_35 [2] : vector<2x8x8xf32> to vector<2x8xf32>
    %107 = vector.shape_cast %106 : vector<2x8xf32> to vector<2x8x1xf32>
    %108 = tpu.reciprocal %107 {approx = true} : vector<2x8x1xf32> -> vector<2x8x1xf32>
    %109 = vector.broadcast %108 : vector<2x8x1xf32> to vector<2x8x8xf32>
    %110 = arith.mulf %105, %109 : vector<2x8x8xf32>
    "tpu.trace_start"() <{level = 10 : i32, message = "bqk,bkd->bqd"}> : () -> ()
    %cst_36 = arith.constant dense<0.000000e+00> : vector<2x8x10xf32>
    %111 = tpu.matmul %110, %93, %cst_36 {dimension_numbers = #tpu.dot_dimension_numbers<[2], [1], [1], [2], [0, 0, 0, 1, 1, 2], [0], [0]>} : vector<2x8x8xf32>, vector<2x8x10xf32>, vector<2x8x10xf32> -> vector<2x8x10xf32>
    "tpu.trace_stop"() : () -> ()
    %112 = vector.shape_cast %111 : vector<2x8x10xf32> to vector<16x10xf32>
    %c2 = arith.constant 2 : index
    %c0_37 = arith.constant 0 : index
    %c0_38 = arith.constant 0 : index
    %113 = vector.load %arg3[%c2, %c0_37, %c0_38] : memref<6x10x64xf32, #tpu.memory_space<vmem>>, vector<1x10x64xf32>
    %114 = vector.shape_cast %113 : vector<1x10x64xf32> to vector<10x64xf32>
    %cst_39 = arith.constant dense<0.000000e+00> : vector<16x64xf32>
    %115 = tpu.matmul %112, %114, %cst_39 {dimension_numbers = #tpu.dot_dimension_numbers<[1], [0], [0], [1], [0, 0, 1, 1], [], []>} : vector<16x10xf32>, vector<10x64xf32>, vector<16x64xf32> -> vector<16x64xf32>
    %116 = arith.addf %90, %115 : vector<16x64xf32>
    %117 = vector.extract_strided_slice %34 {offsets = [0, 0, 30], sizes = [2, 8, 10], strides = [1, 1, 1]} : vector<2x8x180xf32> to vector<2x8x10xf32>
    %118 = vector.extract_strided_slice %34 {offsets = [0, 0, 90], sizes = [2, 8, 10], strides = [1, 1, 1]} : vector<2x8x180xf32> to vector<2x8x10xf32>
    %119 = vector.extract_strided_slice %34 {offsets = [0, 0, 150], sizes = [2, 8, 10], strides = [1, 1, 1]} : vector<2x8x180xf32> to vector<2x8x10xf32>
    "tpu.trace_start"() <{level = 10 : i32, message = "bqd,bkd->bqk"}> : () -> ()
    %cst_40 = arith.constant dense<0.000000e+00> : vector<2x8x8xf32>
    %120 = tpu.matmul %117, %118, %cst_40 {dimension_numbers = #tpu.dot_dimension_numbers<[2], [2], [1], [1], [0, 0, 0, 1, 1, 1], [0], [0]>} : vector<2x8x10xf32>, vector<2x8x10xf32>, vector<2x8x8xf32> -> vector<2x8x8xf32>
    "tpu.trace_stop"() : () -> ()
    %cst_41 = arith.constant 1.250000e-01 : f32
    %121 = vector.broadcast %cst_41 : f32 to vector<2x8x8xf32>
    %122 = arith.mulf %120, %121 : vector<2x8x8xf32>
    %cst_42 = arith.constant -1.000000e+30 : f32
    %123 = vector.shape_cast %37 : vector<1x8x8xi1> to vector<1x8x8xi1>
    %124 = vector.broadcast %123 : vector<1x8x8xi1> to vector<2x8x8xi1>
    %125 = vector.broadcast %cst_42 : f32 to vector<2x8x8xf32>
    %126 = arith.select %124, %122, %125 : vector<2x8x8xi1>, vector<2x8x8xf32>
    %cst_43 = arith.constant dense<0xFF800000> : vector<2x8xf32>
    %127 = vector.multi_reduction <maximumf>, %126, %cst_43 [2] : vector<2x8x8xf32> to vector<2x8xf32>
    %128 = vector.shape_cast %127 : vector<2x8xf32> to vector<2x8x1xf32>
    %129 = vector.broadcast %128 : vector<2x8x1xf32> to vector<2x8x8xf32>
    %130 = arith.subf %126, %129 : vector<2x8x8xf32>
    %131 = math.exp %130 : vector<2x8x8xf32>
    %cst_44 = arith.constant dense<0.000000e+00> : vector<2x8xf32>
    %132 = vector.multi_reduction <add>, %131, %cst_44 [2] : vector<2x8x8xf32> to vector<2x8xf32>
    %133 = vector.shape_cast %132 : vector<2x8xf32> to vector<2x8x1xf32>
    %134 = tpu.reciprocal %133 {approx = true} : vector<2x8x1xf32> -> vector<2x8x1xf32>
    %135 = vector.broadcast %134 : vector<2x8x1xf32> to vector<2x8x8xf32>
    %136 = arith.mulf %131, %135 : vector<2x8x8xf32>
    "tpu.trace_start"() <{level = 10 : i32, message = "bqk,bkd->bqd"}> : () -> ()
    %cst_45 = arith.constant dense<0.000000e+00> : vector<2x8x10xf32>
    %137 = tpu.matmul %136, %119, %cst_45 {dimension_numbers = #tpu.dot_dimension_numbers<[2], [1], [1], [2], [0, 0, 0, 1, 1, 2], [0], [0]>} : vector<2x8x8xf32>, vector<2x8x10xf32>, vector<2x8x10xf32> -> vector<2x8x10xf32>
    "tpu.trace_stop"() : () -> ()
    %138 = vector.shape_cast %137 : vector<2x8x10xf32> to vector<16x10xf32>
    %c3 = arith.constant 3 : index
    %c0_46 = arith.constant 0 : index
    %c0_47 = arith.constant 0 : index
    %139 = vector.load %arg3[%c3, %c0_46, %c0_47] : memref<6x10x64xf32, #tpu.memory_space<vmem>>, vector<1x10x64xf32>
    %140 = vector.shape_cast %139 : vector<1x10x64xf32> to vector<10x64xf32>
    %cst_48 = arith.constant dense<0.000000e+00> : vector<16x64xf32>
    %141 = tpu.matmul %138, %140, %cst_48 {dimension_numbers = #tpu.dot_dimension_numbers<[1], [0], [0], [1], [0, 0, 1, 1], [], []>} : vector<16x10xf32>, vector<10x64xf32>, vector<16x64xf32> -> vector<16x64xf32>
    %142 = arith.addf %116, %141 : vector<16x64xf32>
    %143 = vector.extract_strided_slice %34 {offsets = [0, 0, 40], sizes = [2, 8, 10], strides = [1, 1, 1]} : vector<2x8x180xf32> to vector<2x8x10xf32>
    %144 = vector.extract_strided_slice %34 {offsets = [0, 0, 100], sizes = [2, 8, 10], strides = [1, 1, 1]} : vector<2x8x180xf32> to vector<2x8x10xf32>
    %145 = vector.extract_strided_slice %34 {offsets = [0, 0, 160], sizes = [2, 8, 10], strides = [1, 1, 1]} : vector<2x8x180xf32> to vector<2x8x10xf32>
    "tpu.trace_start"() <{level = 10 : i32, message = "bqd,bkd->bqk"}> : () -> ()
    %cst_49 = arith.constant dense<0.000000e+00> : vector<2x8x8xf32>
    %146 = tpu.matmul %143, %144, %cst_49 {dimension_numbers = #tpu.dot_dimension_numbers<[2], [2], [1], [1], [0, 0, 0, 1, 1, 1], [0], [0]>} : vector<2x8x10xf32>, vector<2x8x10xf32>, vector<2x8x8xf32> -> vector<2x8x8xf32>
    "tpu.trace_stop"() : () -> ()
    %cst_50 = arith.constant 1.250000e-01 : f32
    %147 = vector.broadcast %cst_50 : f32 to vector<2x8x8xf32>
    %148 = arith.mulf %146, %147 : vector<2x8x8xf32>
    %cst_51 = arith.constant -1.000000e+30 : f32
    %149 = vector.shape_cast %37 : vector<1x8x8xi1> to vector<1x8x8xi1>
    %150 = vector.broadcast %149 : vector<1x8x8xi1> to vector<2x8x8xi1>
    %151 = vector.broadcast %cst_51 : f32 to vector<2x8x8xf32>
    %152 = arith.select %150, %148, %151 : vector<2x8x8xi1>, vector<2x8x8xf32>
    %cst_52 = arith.constant dense<0xFF800000> : vector<2x8xf32>
    %153 = vector.multi_reduction <maximumf>, %152, %cst_52 [2] : vector<2x8x8xf32> to vector<2x8xf32>
    %154 = vector.shape_cast %153 : vector<2x8xf32> to vector<2x8x1xf32>
    %155 = vector.broadcast %154 : vector<2x8x1xf32> to vector<2x8x8xf32>
    %156 = arith.subf %152, %155 : vector<2x8x8xf32>
    %157 = math.exp %156 : vector<2x8x8xf32>
    %cst_53 = arith.constant dense<0.000000e+00> : vector<2x8xf32>
    %158 = vector.multi_reduction <add>, %157, %cst_53 [2] : vector<2x8x8xf32> to vector<2x8xf32>
    %159 = vector.shape_cast %158 : vector<2x8xf32> to vector<2x8x1xf32>
    %160 = tpu.reciprocal %159 {approx = true} : vector<2x8x1xf32> -> vector<2x8x1xf32>
    %161 = vector.broadcast %160 : vector<2x8x1xf32> to vector<2x8x8xf32>
    %162 = arith.mulf %157, %161 : vector<2x8x8xf32>
    "tpu.trace_start"() <{level = 10 : i32, message = "bqk,bkd->bqd"}> : () -> ()
    %cst_54 = arith.constant dense<0.000000e+00> : vector<2x8x10xf32>
    %163 = tpu.matmul %162, %145, %cst_54 {dimension_numbers = #tpu.dot_dimension_numbers<[2], [1], [1], [2], [0, 0, 0, 1, 1, 2], [0], [0]>} : vector<2x8x8xf32>, vector<2x8x10xf32>, vector<2x8x10xf32> -> vector<2x8x10xf32>
    "tpu.trace_stop"() : () -> ()
    %164 = vector.shape_cast %163 : vector<2x8x10xf32> to vector<16x10xf32>
    %c4 = arith.constant 4 : index
    %c0_55 = arith.constant 0 : index
    %c0_56 = arith.constant 0 : index
    %165 = vector.load %arg3[%c4, %c0_55, %c0_56] : memref<6x10x64xf32, #tpu.memory_space<vmem>>, vector<1x10x64xf32>
    %166 = vector.shape_cast %165 : vector<1x10x64xf32> to vector<10x64xf32>
    %cst_57 = arith.constant dense<0.000000e+00> : vector<16x64xf32>
    %167 = tpu.matmul %164, %166, %cst_57 {dimension_numbers = #tpu.dot_dimension_numbers<[1], [0], [0], [1], [0, 0, 1, 1], [], []>} : vector<16x10xf32>, vector<10x64xf32>, vector<16x64xf32> -> vector<16x64xf32>
    %168 = arith.addf %142, %167 : vector<16x64xf32>
    %169 = vector.extract_strided_slice %34 {offsets = [0, 0, 50], sizes = [2, 8, 10], strides = [1, 1, 1]} : vector<2x8x180xf32> to vector<2x8x10xf32>
    %170 = vector.extract_strided_slice %34 {offsets = [0, 0, 110], sizes = [2, 8, 10], strides = [1, 1, 1]} : vector<2x8x180xf32> to vector<2x8x10xf32>
    %171 = vector.extract_strided_slice %34 {offsets = [0, 0, 170], sizes = [2, 8, 10], strides = [1, 1, 1]} : vector<2x8x180xf32> to vector<2x8x10xf32>
    "tpu.trace_start"() <{level = 10 : i32, message = "bqd,bkd->bqk"}> : () -> ()
    %cst_58 = arith.constant dense<0.000000e+00> : vector<2x8x8xf32>
    %172 = tpu.matmul %169, %170, %cst_58 {dimension_numbers = #tpu.dot_dimension_numbers<[2], [2], [1], [1], [0, 0, 0, 1, 1, 1], [0], [0]>} : vector<2x8x10xf32>, vector<2x8x10xf32>, vector<2x8x8xf32> -> vector<2x8x8xf32>
    "tpu.trace_stop"() : () -> ()
    %cst_59 = arith.constant 1.250000e-01 : f32
    %173 = vector.broadcast %cst_59 : f32 to vector<2x8x8xf32>
    %174 = arith.mulf %172, %173 : vector<2x8x8xf32>
    %cst_60 = arith.constant -1.000000e+30 : f32
    %175 = vector.shape_cast %37 : vector<1x8x8xi1> to vector<1x8x8xi1>
    %176 = vector.broadcast %175 : vector<1x8x8xi1> to vector<2x8x8xi1>
    %177 = vector.broadcast %cst_60 : f32 to vector<2x8x8xf32>
    %178 = arith.select %176, %174, %177 : vector<2x8x8xi1>, vector<2x8x8xf32>
    %cst_61 = arith.constant dense<0xFF800000> : vector<2x8xf32>
    %179 = vector.multi_reduction <maximumf>, %178, %cst_61 [2] : vector<2x8x8xf32> to vector<2x8xf32>
    %180 = vector.shape_cast %179 : vector<2x8xf32> to vector<2x8x1xf32>
    %181 = vector.broadcast %180 : vector<2x8x1xf32> to vector<2x8x8xf32>
    %182 = arith.subf %178, %181 : vector<2x8x8xf32>
    %183 = math.exp %182 : vector<2x8x8xf32>
    %cst_62 = arith.constant dense<0.000000e+00> : vector<2x8xf32>
    %184 = vector.multi_reduction <add>, %183, %cst_62 [2] : vector<2x8x8xf32> to vector<2x8xf32>
    %185 = vector.shape_cast %184 : vector<2x8xf32> to vector<2x8x1xf32>
    %186 = tpu.reciprocal %185 {approx = true} : vector<2x8x1xf32> -> vector<2x8x1xf32>
    %187 = vector.broadcast %186 : vector<2x8x1xf32> to vector<2x8x8xf32>
    %188 = arith.mulf %183, %187 : vector<2x8x8xf32>
    "tpu.trace_start"() <{level = 10 : i32, message = "bqk,bkd->bqd"}> : () -> ()
    %cst_63 = arith.constant dense<0.000000e+00> : vector<2x8x10xf32>
    %189 = tpu.matmul %188, %171, %cst_63 {dimension_numbers = #tpu.dot_dimension_numbers<[2], [1], [1], [2], [0, 0, 0, 1, 1, 2], [0], [0]>} : vector<2x8x8xf32>, vector<2x8x10xf32>, vector<2x8x10xf32> -> vector<2x8x10xf32>
    "tpu.trace_stop"() : () -> ()
    %190 = vector.shape_cast %189 : vector<2x8x10xf32> to vector<16x10xf32>
    %c5 = arith.constant 5 : index
    %c0_64 = arith.constant 0 : index
    %c0_65 = arith.constant 0 : index
    %191 = vector.load %arg3[%c5, %c0_64, %c0_65] : memref<6x10x64xf32, #tpu.memory_space<vmem>>, vector<1x10x64xf32>
    %192 = vector.shape_cast %191 : vector<1x10x64xf32> to vector<10x64xf32>
    %cst_66 = arith.constant dense<0.000000e+00> : vector<16x64xf32>
    %193 = tpu.matmul %190, %192, %cst_66 {dimension_numbers = #tpu.dot_dimension_numbers<[1], [0], [0], [1], [0, 0, 1, 1], [], []>} : vector<16x10xf32>, vector<10x64xf32>, vector<16x64xf32> -> vector<16x64xf32>
    %194 = arith.addf %168, %193 : vector<16x64xf32>
    %195 = arith.addf %1, %194 : vector<16x64xf32>
    %196 = vector.broadcast %7 : vector<1x64xf32> to vector<16x64xf32>
    %197 = arith.addf %195, %196 : vector<16x64xf32>
    %cst_67 = arith.constant dense<0.000000e+00> : vector<16xf32>
    %198 = vector.multi_reduction <add>, %197, %cst_67 [1] : vector<16x64xf32> to vector<16xf32>
    %199 = vector.shape_cast %198 : vector<16xf32> to vector<16x1xf32>
    %cst_68 = arith.constant 6.400000e+01 : f32
    %200 = vector.broadcast %cst_68 : f32 to vector<16x1xf32>
    %201 = arith.divf %199, %200 : vector<16x1xf32>
    %202 = vector.broadcast %201 : vector<16x1xf32> to vector<16x64xf32>
    %203 = arith.subf %197, %202 : vector<16x64xf32>
    %204 = arith.mulf %203, %203 : vector<16x64xf32>
    %cst_69 = arith.constant dense<0.000000e+00> : vector<16xf32>
    %205 = vector.multi_reduction <add>, %204, %cst_69 [1] : vector<16x64xf32> to vector<16xf32>
    %206 = vector.shape_cast %205 : vector<16xf32> to vector<16x1xf32>
    %cst_70 = arith.constant 6.400000e+01 : f32
    %207 = vector.broadcast %cst_70 : f32 to vector<16x1xf32>
    %208 = arith.divf %206, %207 : vector<16x1xf32>
    %209 = vector.broadcast %201 : vector<16x1xf32> to vector<16x64xf32>
    %210 = arith.subf %197, %209 : vector<16x64xf32>
    %cst_71 = arith.constant 9.99999974E-6 : f32
    %211 = vector.broadcast %cst_71 : f32 to vector<16x1xf32>
    %212 = arith.addf %208, %211 : vector<16x1xf32>
    %213 = math.rsqrt %212 : vector<16x1xf32>
    %214 = vector.broadcast %213 : vector<16x1xf32> to vector<16x64xf32>
    %215 = arith.mulf %210, %214 : vector<16x64xf32>
    %216 = vector.broadcast %5 : vector<1x64xf32> to vector<16x64xf32>
    %217 = arith.mulf %215, %216 : vector<16x64xf32>
    %218 = vector.broadcast %6 : vector<1x64xf32> to vector<16x64xf32>
    %219 = arith.addf %217, %218 : vector<16x64xf32>
    %c0_72 = arith.constant 0 : index
    %c0_73 = arith.constant 0 : index
    %220 = vector.load %arg4[%c0_72, %c0_73] : memref<64x256xf32, #tpu.memory_space<vmem>>, vector<64x256xf32>
    %cst_74 = arith.constant dense<0.000000e+00> : vector<16x256xf32>
    %221 = tpu.matmul %219, %220, %cst_74 {dimension_numbers = #tpu.dot_dimension_numbers<[1], [0], [0], [1], [0, 0, 1, 1], [], []>} : vector<16x64xf32>, vector<64x256xf32>, vector<16x256xf32> -> vector<16x256xf32>
    %222 = vector.broadcast %9 : vector<1x256xf32> to vector<16x256xf32>
    %223 = arith.addf %221, %222 : vector<16x256xf32>
    %cst_75 = arith.constant 0.000000e+00 : f32
    %224 = vector.broadcast %cst_75 : f32 to vector<16x256xf32>
    %225 = arith.maximumf %223, %224 : vector<16x256xf32>
    %c0_76 = arith.constant 0 : index
    %c0_77 = arith.constant 0 : index
    %226 = vector.load %arg5[%c0_76, %c0_77] : memref<256x64xf32, #tpu.memory_space<vmem>>, vector<256x64xf32>
    %cst_78 = arith.constant dense<0.000000e+00> : vector<16x64xf32>
    %227 = tpu.matmul %225, %226, %cst_78 {dimension_numbers = #tpu.dot_dimension_numbers<[1], [0], [0], [1], [0, 0, 1, 1], [], []>} : vector<16x256xf32>, vector<256x64xf32>, vector<16x64xf32> -> vector<16x64xf32>
    %228 = vector.broadcast %8 : vector<1x64xf32> to vector<16x64xf32>
    %229 = arith.addf %227, %228 : vector<16x64xf32>
    %230 = arith.addf %197, %229 : vector<16x64xf32>
    %231 = vector.shape_cast %230 : vector<16x64xf32> to vector<2x8x64xf32>
    %c0_79 = arith.constant 0 : index
    %c0_80 = arith.constant 0 : index
    %c0_81 = arith.constant 0 : index
    %232 = vector.load %arg7[%c0_79, %c0_80, %c0_81] : memref<2x8x64xf32, #tpu.memory_space<vmem>>, vector<2x8x64xf32>
    tpu.vector_store %arg7[%c0_79, %c0_80, %c0_81], %231 {strides = array<i32>} : memref<2x8x64xf32, #tpu.memory_space<vmem>>, vector<2x8x64xf32>,
    return
  }
  func.func @transform_0(%arg0: i32) -> (i32, i32, i32) {
    %c0_i32 = arith.constant 0 : i32
    %c0_i32_0 = arith.constant 0 : i32
    %c0_i32_1 = arith.constant 0 : i32
    return %arg0, %c0_i32, %c0_i32_0 : i32, i32, i32
  }
  func.func @transform_1(%arg0: i32) -> (i32, i32) {
    %c0_i32 = arith.constant 0 : i32
    %c0_i32_0 = arith.constant 0 : i32
    %c0_i32_1 = arith.constant 0 : i32
    return %c0_i32, %c0_i32_0 : i32, i32
  }
  func.func @transform_2(%arg0: i32) -> (i32, i32, i32) {
    %c0_i32 = arith.constant 0 : i32
    %c0_i32_0 = arith.constant 0 : i32
    %c0_i32_1 = arith.constant 0 : i32
    %c0_i32_2 = arith.constant 0 : i32
    return %c0_i32, %c0_i32_0, %c0_i32_1 : i32, i32, i32
  }
  func.func @transform_3(%arg0: i32) -> (i32, i32) {
    %c0_i32 = arith.constant 0 : i32
    %c0_i32_0 = arith.constant 0 : i32
    %c0_i32_1 = arith.constant 0 : i32
    return %c0_i32, %c0_i32_0 : i32, i32
  }
  func.func @transform_4(%arg0: i32) -> (i32, i32) {
    %c0_i32 = arith.constant 0 : i32
    %c0_i32_0 = arith.constant 0 : i32
    %c0_i32_1 = arith.constant 0 : i32
    return %c0_i32, %c0_i32_0 : i32, i32
  }
  func.func @transform_5(%arg0: i32) -> (i32, i32) {
    %c0_i32 = arith.constant 0 : i32
    %c0_i32_0 = arith.constant 0 : i32
    %c0_i32_1 = arith.constant 0 : i32
    return %c0_i32, %c0_i32_0 : i32, i32
  }
  func.func @transform_6(%arg0: i32) -> (i32, i32, i32) {
    %c0_i32 = arith.constant 0 : i32
    %c0_i32_0 = arith.constant 0 : i32
    %c0_i32_1 = arith.constant 0 : i32
    return %arg0, %c0_i32, %c0_i32_0 : i32, i32, i32
  }
}

</mosaic_0001>

<bundles_post_ra>
// kernel: tpu_custom_call.1
= control target key start
LH: loop header
LB: loop body
LE: loop exit
PB: predicated region body
PF: predicated region fallthrough
CT: control target
= control target key end

     0   :  { %vm28_vm0 = vcmask 523264   ;;  %s4212_s0 = inlined_call_operand.vmem [shape: f32[2,8,64], index: 0, kind: input, shape index: {}]   ;;  %s4213_s1 = inlined_call_operand.vmem [shape: f32[64,180], index: 1, kind: input, shape index: {}]   ;;  %s4214_s2 = inlined_call_operand.vmem [shape: f32[6,10,64], index: 2, kind: input, shape index: {}]   ;;  %s4215_s3 = inlined_call_operand.vmem [shape: f32[64,256], index: 3, kind: input, shape index: {}]   ;;  %s4216_s4 = inlined_call_operand.vmem [shape: f32[256,64], index: 4, kind: input, shape index: {}]   ;;  %s4217_s5 = inlined_call_operand.vmem [shape: f32[8,256], index: 5, kind: input, shape index: {}]   ;;  %s4218_s6 = inlined_call_operand.hbm [shape: f32[2,8,64], index: 6, kind: output, shape index: {}]  }
   0x1   :  { %v24_v0 = vld [vmem:[%s4212_s0] sm:$0xff]  ;;  %v25_v1 = vld [vmem:[%s4212_s0 + $0x8] sm:$0xff] }
   0x2   :  { %11 = vsyncpa [#allocation3], 0  ;;  %v29_v2 = vsel %vm28_vm0, %v24_v0, 0.0  ;;  %v32_v3 = vsel %vm28_vm0, %v25_v1, 0.0  ;;  %v69_v14 = vld [vmem:[%s4213_s1 + $0x8] sm:$0xff]  ;;  %v71_v15 = vld [vmem:[%s4213_s1 + $0x18] sm:$0xff]  ;;  %v56_v41 = vlaneseq }
   0x3   :  { %30 = vadd.xlane.f32.xlu0 %v29_v2  ;;  %v3344_v16 = vpack.c.bf16 %v71_v15, %v69_v14  ;;  %v68_v17 = vld [vmem:[%s4213_s1] sm:$0xff]  ;;  %v70_v18 = vld [vmem:[%s4213_s1 + $0x10] sm:$0xff]  ;;  %v73_v20 = vld [vmem:[%s4213_s1 + $0x28] sm:$0xff]  ;;  %v3559_v33 = vmov 0.0   ;;  %vm3560_vm1 = vmmov 0   ;;  %s3561_s10 = smov 68  }
   0x4   :  { %v3346_v19 = vpack.c.bf16 %v70_v18, %v68_v17  ;;  %v75_v21 = vld [vmem:[%s4213_s1 + $0x38] sm:$0xff]  ;;  %v72_v23 = vld [vmem:[%s4213_s1 + $0x20] sm:$0xff]  ;;  %v74_v24 = vld [vmem:[%s4213_s1 + $0x30] sm:$0xff]  ;;  %154 = vmatprep.mubr.f32.mxu0 %v3559_v33  ;;  %3192 = vmatprep.subr.mxu1 %v3559_v33  ;;  %v3677_v45 = vshrl.u32 %v56_v41, 7  ;;  %s3562_s11 = smov 58   ;;  %s3563_s12 = smov 118  }
   0x5   :  { %3345 = vmatprep.subr.bf16.mxu0 %v3344_v16  ;;  %v3348_v22 = vpack.c.bf16 %v75_v21, %v73_v20  ;;  %v3350_v25 = vpack.c.bf16 %v74_v24, %v72_v23  ;;  %v77_v26 = vld [vmem:[%s4213_s1 + $0x48] sm:$0xff]  ;;  %v79_v27 = vld [vmem:[%s4213_s1 + $0x58] sm:$0xff]  ;;  %v76_v28 = vld [vmem:[%s4213_s1 + $0x40] sm:$0xff]  ;;  %3194 = vmatprep.mubr.msk.f32.mxu1 %vm3560_vm1, %v3559_v33  ;;  %vm175_vm2 = vcmask 80896   ;;  %vm333_vm4 = vcmask 64512   ;;  %s3564_s13 = smov 8  }
   0x6   :  { %3347 = vmatpush1.bf16.msra.mxu0 %v3346_v19  ;;  %v3352_v29 = vpack.c.bf16 %v79_v27, %v77_v26  ;;  %v78_v30 = vld [vmem:[%s4213_s1 + $0x50] sm:$0xff]  ;;  %v81_v31 = vld [vmem:[%s4213_s1 + $0x68] sm:$0xff]  ;;  %v83_v32 = vld [vmem:[%s4213_s1 + $0x78] sm:$0xff]  ;;  %v58_v47 = vsub.s32 0, %v3677_v45  ;;  %v64_v49 = vsub.s32 1, %v3677_v45  ;;  %s3565_s14 = smov 48  }
   0x7   :  { %33 = vadd.xlane.f32.xlu0 %v32_v3  ;;  %3349 = vmatprep.subr.bf16.mxu0 %v3348_v22  ;;  %v3354_v34 = vpack.c.bf16 %v78_v30, %v76_v28  ;;  %v3356_v35 = vpack.c.bf16 %v83_v32, %v81_v31  ;;  %v80_v36 = vld [vmem:[%s4213_s1 + $0x60] sm:$0xff]  ;;  %v82_v37 = vld [vmem:[%s4213_s1 + $0x70] sm:$0xff]  ;;  %s3566_s15 = smov 126   ;;  %s3567_s16 = smov 108   ;;  %vm861_vm5 = vcmask 1041408   ;;  %vm3571_vm6 = vmmov 1  }
   0x8   :  { %v3358_v38 = vpack.c.bf16 %v82_v37, %v80_v36  ;;  %v3683_v48 = vld [vmem:[%s4217_s5] sm:$0xff]  ;;  %s3568_s17 = smov 116   ;;  %s3569_s18 = smov 38   ;;  %vm3830_vm7 = vmpackc.low %vm861_vm5, %vm3571_vm6 }
   0x9   :  { %v59_v50 = vrot.slane %v3683_v48, %v58_v47  ;;  %v65_v53 = vrot.slane %v3683_v48, %v64_v49  ;;  %s3570_s19 = smov 98   ;;  %s3572_s24 = smov 28  }
   0xa   :  { %3351 = vmatpush1.bf16.msra.mxu0 %v3350_v25  ;;  %s3573_s1 = smov 106   ;;  %s3574_s9 = smov 88  }
   0xb   :  { %3353 = vmatprep.subr.bf16.mxu0 %v3352_v29  ;;  %s3578_s22 = smov 86  }
   0xe   :  { %3355 = vmatpush1.bf16.msra.mxu0 %v3354_v34 }
   0xf   :  { %3357 = vmatprep.subr.bf16.mxu0 %v3356_v35 }
  0x12   :  { %3359 = vmatpush1.bf16.msra.mxu0 %v3358_v38 }
  0x13   :  { %3182 = vmatprep.subr.mxu0 %v3559_v33 }
  0x90   :  { %v31_v4 = vpop.xlane.xlu0 %30 }
  0x91   :  { %v36_v5 = vmul.f32 0.015625, %v31_v4  ;;  %v170_v4 = vand.u32 127, %v56_v41 }
  0x93   :  { %v38_v6 = vsub.f32 %v24_v0, %v36_v5  ;;  %vm3727_vm3 = vcmp.le.s32.totalorder %v170_v4, %v3677_v45 }
  0x94   :  { %v34_v7 = vpop.xlane.xlu0 %33 }
  0x95   :  { %v37_v8 = vmul.f32 0.015625, %v34_v7  ;;  %v40_v9 = vmul.f32 %v38_v6, %v38_v6 }
  0x97   :  { %v39_v10 = vsub.f32 %v25_v1, %v37_v8  ;;  %v42_v11 = vsel %vm28_vm0, %v40_v9, 0.0 }
  0x98   :  { %43 = vadd.xlane.f32.xlu1 %v42_v11 }
  0x99   :  { %v41_v12 = vmul.f32 %v39_v10, %v39_v10 }
  0x9b   :  { %v45_v13 = vsel %vm28_vm0, %v41_v12, 0.0 }
  0x9c   :  { %46 = vadd.xlane.f32.xlu1 %v45_v13 }
 0x125   :  { %v44_v39 = vpop.xlane.xlu1 %43 }
 0x126   :  { %v48_v40 = vmul.f32 0.015625, %v44_v39 }
 0x128   :  { %v50_v42 = vadd.f32 1e-05, %v48_v40 }
 0x129   :  { %v47_v43 = vpop.xlane.xlu1 %46 }
 0x12a   :  { %3476 = vrsqrt.f32 %v50_v42  ;;  %v49_v44 = vmul.f32 0.015625, %v47_v43 }
 0x12c   :  { %v51_v46 = vadd.f32 1e-05, %v49_v44 }
 0x12e   :  { %3478 = vrsqrt.f32 %v51_v46 }
 0x134   :  { %v3477_v51 = vpop.eup %3476 }
 0x135   :  { %v54_v52 = vmul.f32 %v3477_v51, %v38_v6 }
 0x137   :  { %v60_v54 = vmul.f32 %v59_v50, %v54_v52 }
 0x138   :  { %v3479_v55 = vpop.eup %3478 }
 0x139   :  { %v66_v56 = vadd.f32 %v65_v53, %v60_v54  ;;  %v55_v57 = vmul.f32 %v3479_v55, %v39_v10 }
 0x13b   :  { %3004 = vmatmul.mubr.msk.f32.vlgmr.msra.gmra.mrb[0].mxu0 %vm28_vm0, %v66_v56  ;;  %v61_v58 = vmul.f32 %v59_v50, %v55_v57 }
 0x13c   :  { %160 = vmatprep.mubr.f32.mxu0 %v3559_v33 }
 0x13d   :  { %v67_v59 = vadd.f32 %v65_v53, %v61_v58 }
 0x13f   :  { %3005 = vmatmul.mubr.msk.f32.gmra.mrb[2].mxu0 %vm28_vm0, %v67_v59 }
 0x140   :  { %3184 = vmatprep.mubr.msk.f32.mxu0 %vm3560_vm1, %v3559_v33 }
 0x20e   :  { %v3695_v60 = vpop.f32.mrb[0].mxu0 }
 0x20f   :  { %173 = vrot.lane.b32.xlu0 %v3695_v60, %s3561_s10  ;;  %v3698_v61 = vpop.f32.mrb[1].mxu0 }
 0x212   :  { %v3700_v62 = vpop.f32.mrb[2].mxu0 }
 0x213   :  { %251 = vrot.lane.b32.xlu1 %v3700_v62, %s3561_s10  ;;  %v3703_v63 = vpop.f32.mrb[3].mxu0  ;;  %s3575_s10 = smov 96  }
 0x217   :  { %598 = vrot.lane.b32.xlu1 %v3700_v62, %s3562_s11 }
 0x21b   :  { %596 = vrot.lane.b32.xlu1 %v3700_v62, %s3563_s12 }
 0x281   :  { %v174_v0 = vpop.permute.xlu0 %173 }
 0x282   :  { %3183 = vmatpush3.xpose.msk.msra.mxu0 %vm175_vm2, %v174_v0 }
 0x283   :  { %3187 = vmatprep.subr.mxu0 %v3559_v33 }
 0x285   :  { %v252_v1 = vpop.permute.xlu1 %251  ;;  %3185 = vmatmul.mubr.msk.f32.vlgmr.msra.gmra.mrb[4].mxu0 %vm175_vm2, %v3695_v60 }
 0x286   :  { %3188 = vmatpush3.xpose.msk.msra.mxu0 %vm175_vm2, %v252_v1  ;;  %3189 = vmatprep.mubr.msk.f32.mxu0 %vm3560_vm1, %v3559_v33 }
 0x287   :  { %3207 = vmatprep.subr.mxu0 %v3559_v33 }
 0x289   :  { %v599_v2 = vpop.permute.xlu1 %598  ;;  %3190 = vmatmul.mubr.msk.f32.vlgmr.msra.gmra.mrb[6].mxu0 %vm175_vm2, %v3700_v62 }
 0x28a   :  { %3208 = vmatpush3.xpose.msk.msra.mxu0 %vm175_vm2, %v599_v2  ;;  %3209 = vmatprep.mubr.msk.f32.mxu0 %vm3560_vm1, %v3559_v33 }
 0x28b   :  { %3217 = vmatprep.subr.mxu0 %v3559_v33 }
 0x28d   :  { %v597_v3 = vpop.permute.xlu1 %596 }
 0x28e   :  { %3210 = vmatmul.mubr.msk.f32.vlgmr.msra.gmra.mrb[8].mxu0 %vm175_vm2, %v597_v3 }
 0x28f   :  { %3219 = vmatprep.mubr.msk.f32.mxu0 %vm3560_vm1, %v3559_v33 }
 0x358   :  { %v246_v5 = vpop.f32.mrb[4].mxu0 }
 0x359   :  { %v327_v7 = vmul.f32 0.125, %v246_v5  ;;  %v3186_v8 = vpop.f32.mrb[5].mxu0 }
 0x35b   :  { %v331_v9 = vsel %vm3727_vm3, %v327_v7, -1e+30 }
 0x35c   :  { %v323_v10 = vpop.f32.mrb[6].mxu0  ;;  %v334_v11 = vsel %vm333_vm4, %v331_v9, -inf }
 0x35d   :  { %v328_v12 = vmul.f32 0.125, %v323_v10  ;;  %335 = vmax.xlane.f32.xlu0 %v334_v11  ;;  %v3191_v13 = vpop.f32.mrb[7].mxu0 }
 0x35f   :  { %v332_v14 = vsel %vm3727_vm3, %v328_v12, -1e+30 }
 0x360   :  { %v337_v15 = vsel %vm333_vm4, %v332_v14, -inf }
 0x361   :  { %338 = vmax.xlane.f32.xlu1 %v337_v15  ;;  %v670_v16 = vpop.f32.mrb[8].mxu0 }
 0x362   :  { %v3211_v17 = vpop.f32.mrb[9].mxu0  ;;  %v675_v31 = vmul.f32 0.125, %v670_v16 }
 0x364   :  { %v677_v32 = vsel %vm3727_vm3, %v675_v31, -1e+30 }
 0x365   :  { %v681_v34 = vsel %vm333_vm4, %v677_v32, -inf }
 0x372   :  { %359 = vrot.lane.b32.xlu1 %v3698_v61, %s3564_s13 }
 0x373   :  { %357 = vrot.lane.b32.xlu0 %v3695_v60, %s3564_s13 }
 0x376   :  { %437 = vrot.lane.b32.xlu1 %v3700_v62, %s3564_s13 }
 0x37a   :  { %439 = vrot.lane.b32.xlu1 %v3703_v63, %s3564_s13 }
 0x37e   :  { %518 = vrot.lane.b32.xlu1 %v3695_v60, %s3563_s12  ;;  %s3577_s12 = smov 78  }
 0x382   :  { %1026 = vrot.lane.b32.xlu1 %v3695_v60, %s3565_s14 }
 0x3ea   :  { %v336_v18 = vpop.xlane.xlu0 %335 }
 0x3eb   :  { %v340_v19 = vsub.f32 %v331_v9, %v336_v18 }
 0x3ed   :  { %v342_v20 = vmul.f32 1.442695, %v340_v19 }
 0x3ee   :  { %v339_v21 = vpop.xlane.xlu1 %338  ;;  %v358_v24 = vpop.permute.xlu0 %357 }
 0x3ef   :  { %3480 = vpow2.f32 %v342_v20  ;;  %v341_v22 = vsub.f32 %v332_v14, %v339_v21 }
 0x3f1   :  { %v344_v23 = vmul.f32 1.442695, %v341_v22 }
 0x3f2   :  { %v360_v25 = vpop.permute.xlu1 %359 }
 0x3f3   :  { %3482 = vpow2.f32 %v344_v23  ;;  %v361_v26 = vsel %vm333_vm4, %v358_v24, %v360_v25 }
 0x3f4   :  { %3193 = vmatpush3.msra.mxu1 %v361_v26 }
 0x3f5   :  { %3197 = vmatprep.subr.mxu1 %v3559_v33 }
 0x3f6   :  { %v438_v37 = vpop.permute.xlu1 %437 }
 0x3f9   :  { %v3481_v27 = vpop.eup %3480 }
 0x3fa   :  { %v346_v28 = vsel %vm333_vm4, %v3481_v27, 0.0  ;;  %v440_v39 = vpop.permute.xlu1 %439 }
 0x3fb   :  { %347 = vadd.xlane.f32.xlu0 %v346_v28  ;;  %v441_v41 = vsel %vm333_vm4, %v438_v37, %v440_v39 }
 0x3fd   :  { %v3483_v29 = vpop.eup %3482 }
 0x3fe   :  { %v349_v30 = vsel %vm333_vm4, %v3483_v29, 0.0  ;;  %v519_v46 = vpop.permute.xlu1 %518 }
 0x3ff   :  { %350 = vadd.xlane.f32.xlu0 %v349_v30 }
 0x402   :  { %v1027_v54 = vpop.permute.xlu1 %1026 }
 0x415   :  { %520 = vrot.lane.b32.xlu0 %v3695_v60, %s3562_s11  ;;  %s3576_s11 = smov 18  }
 0x434   :  { %682 = vmax.xlane.f32.xlu0 %v681_v34 }
 0x44a   :  { %776 = vrot.lane.b32.xlu0 %v3703_v63, %s3566_s15 }
 0x44e   :  { %1024 = vrot.lane.b32.xlu0 %v3695_v60, %s3567_s16 }
 0x452   :  { %1102 = vrot.lane.b32.xlu0 %v3700_v62, %s3567_s16 }
 0x488   :  { %v348_v35 = vpop.xlane.xlu0 %347 }
 0x489   :  { %3484 = vrcp.f32 %v348_v35 }
 0x48c   :  { %v351_v36 = vpop.xlane.xlu0 %350 }
 0x48d   :  { %3486 = vrcp.f32 %v351_v36 }
 0x490   :  { %v521_v44 = vpop.permute.xlu0 %520 }
 0x493   :  { %v3485_v38 = vpop.eup %3484 }
 0x494   :  { %v354_v40 = vmul.f32 %v3485_v38, %v3481_v27 }
 0x496   :  { %3195 = vmatmul.mubr.msk.f32.vlgmr.msra.gmra.mrb[0].mxu1 %vm333_vm4, %v354_v40 }
 0x497   :  { %v3487_v42 = vpop.eup %3486  ;;  %3198 = vmatpush3.msra.mxu1 %v441_v41  ;;  %3199 = vmatprep.mubr.msk.f32.mxu1 %vm3560_vm1, %v3559_v33 }
 0x498   :  { %v355_v43 = vmul.f32 %v3487_v42, %v3483_v29  ;;  %3202 = vmatprep.subr.mxu1 %v3559_v33 }
 0x49a   :  { %3200 = vmatmul.mubr.msk.f32.vlgmr.msra.gmra.mrb[2].mxu1 %vm333_vm4, %v355_v43 }
 0x49b   :  { %3204 = vmatprep.mubr.msk.f32.mxu1 %vm3560_vm1, %v3559_v33 }
 0x49e   :  { %3203 = vmatpush3.xpose.msk.msra.mxu1 %vm175_vm2, %v521_v44  ;;  %v3018_v44 = vld [vmem:[%s4214_s2 + $0x10] sm:$0xff] }
 0x49f   :  { %3212 = vmatprep.subr.mxu1 %v3559_v33 }
 0x4a1   :  { %3205 = vmatmul.mubr.msk.f32.vlgmr.msra.gmra.mrb[4].mxu1 %vm175_vm2, %v519_v46  ;;  %v3019_v46 = vld [vmem:[%s4214_s2 + $0x18] sm:$0x3] }
 0x4a2   :  { %3214 = vmatprep.mubr.msk.f32.mxu1 %vm3560_vm1, %v3559_v33 }
 0x4c1   :  { %v683_v47 = vpop.xlane.xlu0 %682 }
 0x4c2   :  { %v685_v49 = vsub.f32 %v677_v32, %v683_v47  ;;  %v3360_v47 = vpack.c.bf16 %v3019_v46, %v3018_v44 }
 0x4c4   :  { %v688_v50 = vmul.f32 1.442695, %v685_v49 }
 0x4c5   :  { %v777_v51 = vpop.permute.xlu0 %776 }
 0x4c6   :  { %3488 = vpow2.f32 %v688_v50  ;;  %3218 = vmatpush3.msra.mxu0 %v777_v51  ;;  %v516_v50 = vld [vmem:[%s4214_s2] sm:$0xff]  ;;  %v517_v51 = vld [vmem:[%s4214_s2 + $0x8] sm:$0x3] }
 0x4c7   :  { %3236 = vmatprep.subr.mxu0 %v3559_v33 }
 0x4c9   :  { %v1025_v1 = vpop.permute.xlu0 %1024 }
 0x4cd   :  { %v1103_v4 = vpop.permute.xlu0 %1102 }
 0x4d0   :  { %v3489_v52 = vpop.eup %3488 }
 0x4d1   :  { %v693_v53 = vsel %vm333_vm4, %v3489_v52, 0.0 }
 0x4d2   :  { %694 = vadd.xlane.f32.xlu1 %v693_v53 }
 0x4e3   :  { %1104 = vrot.lane.b32.xlu1 %v3700_v62, %s3565_s14 }
 0x55f   :  { %v695_v55 = vpop.xlane.xlu1 %694 }
 0x560   :  { %3490 = vrcp.f32 %v695_v55 }
 0x563   :  { %v1105_v3 = vpop.permute.xlu1 %1104 }
 0x569   :  { %v3779_v56 = vpop.f32.mrb[0].mxu1 }
 0x56a   :  { %v3491_v57 = vpop.eup %3490  ;;  %v3196_v58 = vpop.f32.mrb[1].mxu1 }
 0x56b   :  { %v699_v59 = vmul.f32 %v3491_v57, %v3489_v52  ;;  %v3366_v52 = vpack.c.bf16 %v517_v51, %v516_v50 }
 0x56d   :  { %v3781_v0 = vpop.f32.mrb[2].mxu1  ;;  %3220 = vmatmul.mubr.msk.f32.vlgmr.msra.gmra.mrb[10].mxu0 %vm333_vm4, %v699_v59 }
 0x56e   :  { %3237 = vmatpush3.xpose.msk.msra.mxu0 %vm175_vm2, %v1027_v54  ;;  %v3201_v2 = vpop.f32.mrb[3].mxu1  ;;  %3238 = vmatprep.mubr.msk.f32.mxu0 %vm3560_vm1, %v3559_v33 }
 0x56f   :  { %3241 = vmatprep.subr.mxu0 %v3559_v33 }
 0x571   :  { %3239 = vmatmul.mubr.msk.f32.vlgmr.msra.gmra.mrb[12].mxu0 %vm175_vm2, %v1025_v1 }
 0x572   :  { %3242 = vmatpush3.xpose.msk.msra.mxu0 %vm175_vm2, %v1105_v3  ;;  %3243 = vmatprep.mubr.msk.f32.mxu0 %vm3560_vm1, %v3559_v33 }
 0x573   :  { %3251 = vmatprep.subr.mxu0 %v3559_v33 }
 0x574   :  { %v592_v5 = vpop.f32.mrb[4].mxu1 }
 0x575   :  { %v674_v7 = vmul.f32 0.125, %v592_v5  ;;  %v3206_v8 = vpop.f32.mrb[5].mxu1  ;;  %3244 = vmatmul.mubr.msk.f32.vlgmr.msra.gmra.mrb[14].mxu0 %vm175_vm2, %v1103_v4  ;;  %v3032_v5 = vld [vmem:[%s4214_s2 + $0x20] sm:$0xff] }
 0x576   :  { %3253 = vmatprep.mubr.msk.f32.mxu0 %vm3560_vm1, %v3559_v33 }
 0x577   :  { %v676_v9 = vsel %vm3727_vm3, %v674_v7, -1e+30  ;;  %v3033_v7 = vld [vmem:[%s4214_s2 + $0x28] sm:$0x3] }
 0x578   :  { %v678_v10 = vsel %vm333_vm4, %v676_v9, -inf  ;;  %v3372_v8 = vpack.c.bf16 %v3033_v7, %v3032_v5 }
 0x579   :  { %679 = vmax.xlane.f32.xlu1 %v678_v10 }
 0x606   :  { %v680_v11 = vpop.xlane.xlu1 %679 }
 0x607   :  { %v684_v12 = vsub.f32 %v676_v9, %v680_v11 }
 0x609   :  { %v686_v13 = vmul.f32 1.442695, %v684_v12 }
 0x60b   :  { %3492 = vpow2.f32 %v686_v13 }
 0x615   :  { %v3493_v14 = vpop.eup %3492 }
 0x616   :  { %v690_v15 = vsel %vm333_vm4, %v3493_v14, 0.0 }
 0x617   :  { %691 = vadd.xlane.f32.xlu0 %v690_v15 }
 0x62d   :  { %700 = vrot.lane.b32.xlu0 %v3698_v61, %s3566_s15 }
 0x631   :  { %1282 = vrot.lane.b32.xlu0 %v3703_v63, %s3568_s17 }
 0x635   :  { %1449 = vrot.lane.b32.xlu0 %v3695_v60, %s3569_s18 }
 0x639   :  { %1447 = vrot.lane.b32.xlu0 %v3695_v60, %s3570_s19 }
 0x63d   :  { %1527 = vrot.lane.b32.xlu0 %v3700_v62, %s3569_s18 }
 0x640   :  { %v3808_v16 = vpop.f32.mrb[10].mxu0 }
 0x641   :  { %v3221_v17 = vpop.f32.mrb[11].mxu0 }
 0x644   :  { %v1098_v18 = vpop.f32.mrb[12].mxu0 }
 0x645   :  { %v1180_v19 = vmul.f32 0.125, %v1098_v18  ;;  %v3240_v20 = vpop.f32.mrb[13].mxu0 }
 0x647   :  { %v1182_v21 = vsel %vm3727_vm3, %v1180_v19, -1e+30 }
 0x648   :  { %v1176_v22 = vpop.f32.mrb[14].mxu0  ;;  %v1184_v23 = vsel %vm333_vm4, %v1182_v21, -inf }
 0x649   :  { %v1181_v24 = vmul.f32 0.125, %v1176_v22  ;;  %1185 = vmax.xlane.f32.xlu1 %v1184_v23  ;;  %v3245_v25 = vpop.f32.mrb[15].mxu0 }
 0x64b   :  { %v1183_v26 = vsel %vm3727_vm3, %v1181_v24, -1e+30 }
 0x64c   :  { %v1187_v27 = vsel %vm333_vm4, %v1183_v26, -inf }
 0x64d   :  { %1188 = vmax.xlane.f32.xlu1 %v1187_v27 }
 0x6a4   :  { %v692_v28 = vpop.xlane.xlu0 %691 }
 0x6a5   :  { %3494 = vrcp.f32 %v692_v28 }
 0x6a8   :  { %v701_v29 = vpop.permute.xlu0 %700 }
 0x6a9   :  { %3213 = vmatpush3.msra.mxu1 %v701_v29 }
 0x6aa   :  { %3362 = vmatprep.subr.msk.bf16.mxu1 %vm3830_vm7, %v3360_v47 }
 0x6ac   :  { %v1283_v30 = vpop.permute.xlu0 %1282 }
 0x6ad   :  { %3252 = vmatpush3.msra.mxu0 %v1283_v30 }
 0x6ae   :  { %3263 = vmatprep.subr.mxu0 %v3559_v33 }
 0x6af   :  { %v3495_v31 = vpop.eup %3494 }
 0x6b0   :  { %v698_v32 = vmul.f32 %v3495_v31, %v3493_v14  ;;  %v1450_v57 = vpop.permute.xlu0 %1449 }
 0x6b2   :  { %3215 = vmatmul.mubr.msk.f32.vlgmr.msra.gmra.mrb[6].mxu1 %vm333_vm4, %v698_v32 }
 0x6b3   :  { %3365 = vmatpush3.bf16.msk.msra.mxu1 %vm3830_vm7, %v3360_v47 }
 0x6b4   :  { %3368 = vmatprep.subr.msk.bf16.mxu1 %vm3830_vm7, %v3366_v52  ;;  %v1448_v2 = vpop.permute.xlu0 %1447 }
 0x6b8   :  { %v1528_v17 = vpop.permute.xlu0 %1527 }
 0x6d6   :  { %v1186_v34 = vpop.xlane.xlu1 %1185 }
 0x6d7   :  { %v1190_v35 = vsub.f32 %v1182_v21, %v1186_v34 }
 0x6d9   :  { %v1192_v36 = vmul.f32 1.442695, %v1190_v35 }
 0x6da   :  { %v1189_v37 = vpop.xlane.xlu1 %1188 }
 0x6db   :  { %3496 = vpow2.f32 %v1192_v36  ;;  %v1191_v38 = vsub.f32 %v1183_v26, %v1189_v37 }
 0x6dd   :  { %v1194_v39 = vmul.f32 1.442695, %v1191_v38 }
 0x6df   :  { %3498 = vpow2.f32 %v1194_v39 }
 0x6e5   :  { %v3497_v40 = vpop.eup %3496 }
 0x6e6   :  { %v1196_v41 = vsel %vm333_vm4, %v3497_v40, 0.0 }
 0x6e7   :  { %1197 = vadd.xlane.f32.xlu1 %v1196_v41 }
 0x6e9   :  { %v3499_v42 = vpop.eup %3498 }
 0x6ea   :  { %v1199_v43 = vsel %vm333_vm4, %v3499_v42, 0.0 }
 0x6eb   :  { %1200 = vadd.xlane.f32.xlu1 %v1199_v43 }
 0x6fc   :  { %1206 = vrot.lane.b32.xlu1 %v3698_v61, %s3568_s17 }
 0x700   :  { %1525 = vrot.lane.b32.xlu1 %v3700_v62, %s3570_s19 }
 0x704   :  { %1872 = vrot.lane.b32.xlu1 %v3695_v60, %s3572_s24 }
 0x774   :  { %v1198_v53 = vpop.xlane.xlu1 %1197 }
 0x778   :  { %v1201_v54 = vpop.xlane.xlu1 %1200 }
 0x779   :  { %3500 = vrcp.f32 %v1201_v54 }
 0x77a   :  { %3502 = vrcp.f32 %v1198_v53 }
 0x77c   :  { %v1207_v4 = vpop.permute.xlu1 %1206 }
 0x780   :  { %v1526_v18 = vpop.permute.xlu1 %1525 }
 0x783   :  { %v3501_v55 = vpop.eup %3500 }
 0x784   :  { %v1205_v58 = vmul.f32 %v3501_v55, %v3499_v42  ;;  %v3503_v3 = vpop.eup %3502  ;;  %v1873_v30 = vpop.permute.xlu1 %1872 }
 0x785   :  { %v772_v59 = vpop.f32.mrb[6].mxu1 }
 0x786   :  { %v3216_v1 = vpop.f32.mrb[7].mxu1  ;;  %3226 = vmatprep.mubr.msk.f32.mxu1 %vm175_vm2, %v772_v59  ;;  %3254 = vmatmul.mubr.msk.f32.vlgmr.msra.gmra.mrb[16].mxu0 %vm333_vm4, %v1205_v58 }
 0x787   :  { %3227 = vmatmul.mubr.msk.f32.vlgmr.msra.gmra.mrb[8].mxu1 %vm175_vm2, %v3808_v16  ;;  %3264 = vmatpush3.xpose.msk.msra.mxu0 %vm175_vm2, %v1450_v57 }
 0x788   :  { %3233 = vmatprep.mubr.msk.f32.mxu1 %vm175_vm2, %v3779_v56  ;;  %3265 = vmatprep.mubr.msk.f32.mxu0 %vm3560_vm1, %v3559_v33  ;;  %v1204_v56 = vmul.f32 %v3503_v3, %v3497_v40 }
 0x789   :  { %3371 = vmatpush3.bf16.msk.msra.mxu1 %vm3830_vm7, %v3366_v52  ;;  %3273 = vmatprep.subr.mxu0 %v3559_v33 }
 0x78a   :  { %3266 = vmatmul.mubr.msk.f32.vlgmr.msra.gmra.mrb[18].mxu0 %vm175_vm2, %v1448_v2  ;;  %3246 = vmatprep.subr.mxu1 %v3559_v33 }
 0x78b   :  { %3275 = vmatprep.mubr.msk.f32.mxu0 %vm3560_vm1, %v3559_v33 }
 0x78f   :  { %3234 = vmatmul.mubr.msk.f32.vlgmr.msra.gmra.mrb[8].mxu1 %vm175_vm2, %v3781_v0 }
 0x790   :  { %3247 = vmatpush3.msra.mxu1 %v1207_v4  ;;  %3248 = vmatprep.mubr.msk.f32.mxu1 %vm3560_vm1, %v3559_v33  ;;  %v3043_v4 = vld [vmem:[%s4214_s2 + $0x30] sm:$0xff] }
 0x791   :  { %3374 = vmatprep.subr.msk.bf16.mxu1 %vm3830_vm7, %v3372_v8 }
 0x793   :  { %3249 = vmatmul.mubr.msk.f32.vlgmr.msra.gmra.mrb[10].mxu1 %vm333_vm4, %v1204_v56  ;;  %v3044_v56 = vld [vmem:[%s4214_s2 + $0x38] sm:$0x3] }
 0x794   :  { %3377 = vmatpush3.bf16.msk.msra.mxu1 %vm3830_vm7, %v3372_v8  ;;  %v3378_v5 = vpack.c.bf16 %v3044_v56, %v3043_v4 }
 0x795   :  { %3268 = vmatprep.subr.mxu1 %v3559_v33 }
 0x859   :  { %v1354_v0 = vpop.f32.mrb[16].mxu0 }
 0x85a   :  { %v3255_v9 = vpop.f32.mrb[17].mxu0 }
 0x85d   :  { %v1521_v10 = vpop.f32.mrb[18].mxu0 }
 0x85e   :  { %v1603_v11 = vmul.f32 0.125, %v1521_v10  ;;  %v3267_v12 = vpop.f32.mrb[19].mxu0 }
 0x860   :  { %v1605_v13 = vsel %vm3727_vm3, %v1603_v11, -1e+30 }
 0x861   :  { %v1607_v14 = vsel %vm333_vm4, %v1605_v13, -inf }
 0x862   :  { %1608 = vmax.xlane.f32.xlu0 %v1607_v14 }
 0x866   :  { %v1278_v15 = vpop.f32.mrb[10].mxu1 }
 0x867   :  { %v3250_v16 = vpop.f32.mrb[11].mxu1  ;;  %3260 = vmatprep.mubr.msk.f32.mxu1 %vm175_vm2, %v1278_v15 }
 0x868   :  { %3261 = vmatmul.mubr.msk.f32.vlgmr.msra.gmra.mrb[8].mxu1 %vm175_vm2, %v1354_v0 }
 0x869   :  { %3269 = vmatpush3.xpose.msk.msra.mxu1 %vm175_vm2, %v1528_v17  ;;  %3270 = vmatprep.mubr.msk.f32.mxu1 %vm3560_vm1, %v3559_v33 }
 0x86a   :  { %3278 = vmatprep.subr.mxu1 %v3559_v33 }
 0x86c   :  { %3271 = vmatmul.mubr.msk.f32.vlgmr.msra.gmra.mrb[12].mxu1 %vm175_vm2, %v1526_v18 }
 0x86d   :  { %3280 = vmatprep.mubr.msk.f32.mxu1 %vm3560_vm1, %v3559_v33 }
 0x878   :  { %1629 = vrot.lane.b32.xlu0 %v3698_v61, %s3573_s1 }
 0x87c   :  { %1870 = vrot.lane.b32.xlu0 %v3695_v60, %s3574_s9 }
 0x880   :  { %1948 = vrot.lane.b32.xlu0 %v3700_v62, %s3574_s9 }
 0x8ef   :  { %v1609_v19 = vpop.xlane.xlu0 %1608 }
 0x8f0   :  { %v1613_v20 = vsub.f32 %v1605_v13, %v1609_v19  ;;  %v3054_v19 = vld [vmem:[%s4214_s2 + $0x40] sm:$0xff] }
 0x8f2   :  { %v1615_v21 = vmul.f32 1.442695, %v1613_v20  ;;  %v3055_v20 = vld [vmem:[%s4214_s2 + $0x48] sm:$0x3] }
 0x8f3   :  { %v1630_v22 = vpop.permute.xlu0 %1629 }
 0x8f4   :  { %3504 = vpow2.f32 %v1615_v21  ;;  %3274 = vmatpush3.msra.mxu0 %v1630_v22 }
 0x8f5   :  { %3290 = vmatprep.subr.mxu0 %v3559_v33 }
 0x8f7   :  { %v1871_v35 = vpop.permute.xlu0 %1870 }
 0x8fb   :  { %v1949_v37 = vpop.permute.xlu0 %1948 }
 0x8fe   :  { %v3505_v23 = vpop.eup %3504 }
 0x8ff   :  { %v1619_v24 = vsel %vm333_vm4, %v3505_v23, 0.0 }
 0x900   :  { %1620 = vadd.xlane.f32.xlu1 %v1619_v24 }
 0x911   :  { %1950 = vrot.lane.b32.xlu1 %v3700_v62, %s3572_s24 }
 0x93f   :  { %v1599_v25 = vpop.f32.mrb[12].mxu1 }
 0x940   :  { %v1604_v26 = vmul.f32 0.125, %v1599_v25  ;;  %v3272_v27 = vpop.f32.mrb[13].mxu1 }
 0x942   :  { %v1606_v28 = vsel %vm3727_vm3, %v1604_v26, -1e+30 }
 0x943   :  { %v1610_v29 = vsel %vm333_vm4, %v1606_v28, -inf }
 0x944   :  { %1611 = vmax.xlane.f32.xlu1 %v1610_v29 }
 0x98d   :  { %v1621_v31 = vpop.xlane.xlu1 %1620 }
 0x98e   :  { %3506 = vrcp.f32 %v1621_v31 }
 0x991   :  { %v1951_v36 = vpop.permute.xlu1 %1950 }
 0x998   :  { %v3507_v32 = vpop.eup %3506 }
 0x999   :  { %v1627_v34 = vmul.f32 %v3507_v32, %v3505_v23 }
 0x99b   :  { %3276 = vmatmul.mubr.msk.f32.vlgmr.msra.gmra.mrb[20].mxu0 %vm333_vm4, %v1627_v34 }
 0x99c   :  { %3291 = vmatpush3.xpose.msk.msra.mxu0 %vm175_vm2, %v1873_v30  ;;  %3292 = vmatprep.mubr.msk.f32.mxu0 %vm3560_vm1, %v3559_v33 }
 0x99d   :  { %3295 = vmatprep.subr.mxu0 %v3559_v33 }
 0x99f   :  { %3293 = vmatmul.mubr.msk.f32.vlgmr.msra.gmra.mrb[22].mxu0 %vm175_vm2, %v1871_v35 }
 0x9a0   :  { %3296 = vmatpush3.xpose.msk.msra.mxu0 %vm175_vm2, %v1951_v36  ;;  %3297 = vmatprep.mubr.msk.f32.mxu0 %vm3560_vm1, %v3559_v33 }
 0x9a1   :  { %3305 = vmatprep.subr.mxu0 %v3559_v33 }
 0x9a3   :  { %3298 = vmatmul.mubr.msk.f32.vlgmr.msra.gmra.mrb[24].mxu0 %vm175_vm2, %v1949_v37 }
 0x9a4   :  { %3307 = vmatprep.mubr.msk.f32.mxu0 %vm3560_vm1, %v3559_v33 }
 0x9d1   :  { %v1612_v38 = vpop.xlane.xlu1 %1611 }
 0x9d2   :  { %v1614_v39 = vsub.f32 %v1606_v28, %v1612_v38 }
 0x9d4   :  { %v1617_v40 = vmul.f32 1.442695, %v1614_v39 }
 0x9d6   :  { %3508 = vpow2.f32 %v1617_v40 }
 0x9e0   :  { %v3509_v41 = vpop.eup %3508 }
 0x9e1   :  { %v1622_v42 = vsel %vm333_vm4, %v3509_v41, 0.0 }
 0x9e2   :  { %1623 = vadd.xlane.f32.xlu0 %v1622_v42 }
 0x9f8   :  { %1705 = vrot.lane.b32.xlu0 %v3703_v63, %s3573_s1 }
 0x9fc   :  { %2128 = vrot.lane.b32.xlu0 %v3703_v63, %s3575_s10 }
 0xa00   :  { %2295 = vrot.lane.b32.xlu0 %v3695_v60, %s3576_s11 }
 0xa04   :  { %2373 = vrot.lane.b32.xlu0 %v3700_v62, %s3576_s11 }
 0xa08   :  { %2293 = vrot.lane.b32.xlu0 %v3695_v60, %s3577_s12 }
 0xa6e   :  { %v1701_v43 = vpop.f32.mrb[20].mxu0 }
 0xa6f   :  { %v1624_v44 = vpop.xlane.xlu0 %1623  ;;  %v3277_v46 = vpop.f32.mrb[21].mxu0 }
 0xa70   :  { %3510 = vrcp.f32 %v1624_v44 }
 0xa72   :  { %v1944_v47 = vpop.f32.mrb[22].mxu0 }
 0xa73   :  { %v1706_v50 = vpop.permute.xlu0 %1705  ;;  %v2026_v51 = vmul.f32 0.125, %v1944_v47  ;;  %v3294_v52 = vpop.f32.mrb[23].mxu0 }
 0xa74   :  { %3279 = vmatpush3.msra.mxu1 %v1706_v50 }
 0xa75   :  { %v2028_v53 = vsel %vm3727_vm3, %v2026_v51, -1e+30  ;;  %3380 = vmatprep.subr.msk.bf16.mxu1 %vm3830_vm7, %v3378_v5 }
 0xa76   :  { %v2022_v54 = vpop.f32.mrb[24].mxu0  ;;  %v2030_v55 = vsel %vm333_vm4, %v2028_v53, -inf }
 0xa77   :  { %v2129_v57 = vpop.permute.xlu0 %2128  ;;  %v2027_v58 = vmul.f32 0.125, %v2022_v54  ;;  %2031 = vmax.xlane.f32.xlu1 %v2030_v55  ;;  %v3299_v59 = vpop.f32.mrb[25].mxu0 }
 0xa78   :  { %3306 = vmatpush3.msra.mxu0 %v2129_v57 }
 0xa79   :  { %v2029_v60 = vsel %vm3727_vm3, %v2027_v58, -1e+30  ;;  %3317 = vmatprep.subr.mxu0 %v3559_v33 }
 0xa7a   :  { %v3511_v1 = vpop.eup %3510  ;;  %v2033_v2 = vsel %vm333_vm4, %v2029_v60, -inf }
 0xa7b   :  { %v1628_v3 = vmul.f32 %v3511_v1, %v3509_v41  ;;  %2034 = vmax.xlane.f32.xlu1 %v2033_v2  ;;  %v2296_v23 = vpop.permute.xlu0 %2295 }
 0xa7d   :  { %3281 = vmatmul.mubr.msk.f32.vlgmr.msra.gmra.mrb[14].mxu1 %vm333_vm4, %v1628_v3 }
 0xa7e   :  { %3287 = vmatprep.mubr.msk.f32.mxu1 %vm175_vm2, %v1701_v43  ;;  %3383 = vmatpush3.bf16.msk.msra.mxu1 %vm3830_vm7, %v3378_v5  ;;  %v3066_v5 = vld [vmem:[%s4214_s2 + $0x58] sm:$0x3] }
 0xa7f   :  { %3300 = vmatprep.subr.mxu1 %v3559_v33  ;;  %v2374_v27 = vpop.permute.xlu0 %2373 }
 0xa83   :  { %v2294_v29 = vpop.permute.xlu0 %2293 }
 0xb04   :  { %v2032_v7 = vpop.xlane.xlu1 %2031 }
 0xb05   :  { %v2036_v8 = vsub.f32 %v2028_v53, %v2032_v7 }
 0xb07   :  { %v2038_v0 = vmul.f32 1.442695, %v2036_v8 }
 0xb08   :  { %v2035_v9 = vpop.xlane.xlu1 %2034 }
 0xb09   :  { %3512 = vpow2.f32 %v2038_v0  ;;  %v2037_v10 = vsub.f32 %v2029_v60, %v2035_v9 }
 0xb0b   :  { %v2040_v11 = vmul.f32 1.442695, %v2037_v10 }
 0xb0d   :  { %3514 = vpow2.f32 %v2040_v11  ;;  %v2720_v11 = vsub.s32 4, %v3677_v45 }
 0xb13   :  { %v3513_v12 = vpop.eup %3512 }
 0xb14   :  { %v2042_v13 = vsel %vm333_vm4, %v3513_v12, 0.0 }
 0xb15   :  { %2043 = vadd.xlane.f32.xlu1 %v2042_v13 }
 0xb17   :  { %v3515_v14 = vpop.eup %3514 }
 0xb18   :  { %v2045_v15 = vsel %vm333_vm4, %v3515_v14, 0.0 }
 0xb19   :  { %2046 = vadd.xlane.f32.xlu1 %v2045_v15 }
 0xb2a   :  { %2052 = vrot.lane.b32.xlu1 %v3698_v61, %s3575_s10 }
 0xb2e   :  { %2371 = vrot.lane.b32.xlu1 %v3700_v62, %s3577_s12  ;;  %v3384_v62 = vpack.c.bf16 %v3055_v20, %v3054_v19 }
 0xb50   :  { %v1777_v16 = vpop.f32.mrb[14].mxu1 }
 0xb51   :  { %v3282_v17 = vpop.f32.mrb[15].mxu1  ;;  %3288 = vmatmul.mubr.msk.f32.vlgmr.msra.gmra.mrb[8].mxu1 %vm175_vm2, %v1777_v16  ;;  %v3533_v16 = vld [vmem:[%s4212_s0] sm:$0xff] }
 0xb52   :  { %3302 = vmatprep.mubr.msk.f32.mxu1 %vm3560_vm1, %v3559_v33 }
 0xba2   :  { %v2044_v18 = vpop.xlane.xlu1 %2043 }
 0xba3   :  { %3516 = vrcp.f32 %v2044_v18 }
 0xba6   :  { %v2047_v21 = vpop.xlane.xlu1 %2046 }
 0xba7   :  { %3518 = vrcp.f32 %v2047_v21 }
 0xbaa   :  { %v2053_v22 = vpop.permute.xlu1 %2052 }
 0xbab   :  { %3301 = vmatpush3.msra.mxu1 %v2053_v22 }
 0xbac   :  { %3386 = vmatprep.subr.msk.bf16.mxu1 %vm3830_vm7, %v3384_v62 }
 0xbad   :  { %v3517_v24 = vpop.eup %3516 }
 0xbae   :  { %v2050_v25 = vmul.f32 %v3517_v24, %v3513_v12  ;;  %v2372_v35 = vpop.permute.xlu1 %2371  ;;  %v2721_v12 = vrot.slane %v3683_v48, %v2720_v11  ;;  %v2878_v11 = vld [vmem:[%s4216_s4 + $0x28] sm:$0xff] }
 0xbb0   :  { %3303 = vmatmul.mubr.msk.f32.vlgmr.msra.gmra.mrb[16].mxu1 %vm333_vm4, %v2050_v25 }
 0xbb1   :  { %v3519_v26 = vpop.eup %3518  ;;  %3389 = vmatpush3.bf16.msk.msra.mxu1 %vm3830_vm7, %v3384_v62 }
 0xbb2   :  { %v2051_v28 = vmul.f32 %v3519_v26, %v3515_v14  ;;  %3322 = vmatprep.subr.mxu1 %v3559_v33  ;;  %v3532_v14 = vld [vmem:[%s4212_s0 + $0x8] sm:$0xff] }
 0xbb4   :  { %3308 = vmatmul.mubr.msk.f32.vlgmr.msra.gmra.mrb[26].mxu0 %vm333_vm4, %v2051_v28 }
 0xbb5   :  { %3318 = vmatpush3.xpose.msk.msra.mxu0 %vm175_vm2, %v2296_v23  ;;  %3319 = vmatprep.mubr.msk.f32.mxu0 %vm3560_vm1, %v3559_v33 }
 0xbb6   :  { %3327 = vmatprep.subr.mxu0 %v3559_v33 }
 0xbb8   :  { %3320 = vmatmul.mubr.msk.f32.vlgmr.msra.gmra.mrb[28].mxu0 %vm175_vm2, %v2294_v29 }
 0xbb9   :  { %3329 = vmatprep.mubr.msk.f32.mxu0 %vm3560_vm1, %v3559_v33 }
 0xc83   :  { %v2124_v30 = vpop.f32.mrb[16].mxu1 }
 0xc84   :  { %v3304_v31 = vpop.f32.mrb[17].mxu1  ;;  %3314 = vmatprep.mubr.msk.f32.mxu1 %vm175_vm2, %v2124_v30  ;;  %v2763_v30 = vld [vmem:[%s4215_s3 + $0x8] sm:$0xff] }
 0xc85   :  { %v2765_v31 = vld [vmem:[%s4215_s3 + $0x18] sm:$0xff] }
 0xc87   :  { %v2200_v32 = vpop.f32.mrb[26].mxu0 }
 0xc88   :  { %v3309_v34 = vpop.f32.mrb[27].mxu0  ;;  %3315 = vmatmul.mubr.msk.f32.vlgmr.msra.gmra.mrb[8].mxu1 %vm175_vm2, %v2200_v32  ;;  %v3396_v32 = vpack.c.bf16 %v2765_v31, %v2763_v30  ;;  %v2884_v30 = vld [vmem:[%s4216_s4 + $0x58] sm:$0xff]  ;;  %v2901_v31 = vld [vmem:[%s4216_s4 + $0xe0] sm:$0xff] }
 0xc89   :  { %3323 = vmatpush3.xpose.msk.msra.mxu1 %vm175_vm2, %v2374_v27  ;;  %3324 = vmatprep.mubr.msk.f32.mxu1 %vm3560_vm1, %v3559_v33  ;;  %v2762_v34 = vld [vmem:[%s4215_s3] sm:$0xff] }
 0xc8a   :  { %3332 = vmatprep.subr.mxu1 %v3559_v33 }
 0xc8b   :  { %v2367_v36 = vpop.f32.mrb[28].mxu0 }
 0xc8c   :  { %v2449_v37 = vmul.f32 0.125, %v2367_v36  ;;  %v3321_v38 = vpop.f32.mrb[29].mxu0  ;;  %3325 = vmatmul.mubr.msk.f32.vlgmr.msra.gmra.mrb[18].mxu1 %vm175_vm2, %v2372_v35  ;;  %v2764_v35 = vld [vmem:[%s4215_s3 + $0x10] sm:$0xff] }
 0xc8d   :  { %3334 = vmatprep.mubr.msk.f32.mxu1 %vm3560_vm1, %v3559_v33  ;;  %v3398_v36 = vpack.c.bf16 %v2764_v35, %v2762_v34  ;;  %v2769_v38 = vld [vmem:[%s4215_s3 + $0x38] sm:$0xff] }
 0xc8e   :  { %v2451_v39 = vsel %vm3727_vm3, %v2449_v37, -1e+30  ;;  %v2767_v37 = vld [vmem:[%s4215_s3 + $0x28] sm:$0xff] }
 0xc8f   :  { %v2453_v40 = vsel %vm333_vm4, %v2451_v39, -inf }
 0xc90   :  { %2454 = vmax.xlane.f32.xlu0 %v2453_v40  ;;  %v2766_v40 = vld [vmem:[%s4215_s3 + $0x20] sm:$0xff] }
 0xd1d   :  { %v2455_v41 = vpop.xlane.xlu0 %2454 }
 0xd1e   :  { %v2459_v42 = vsub.f32 %v2451_v39, %v2455_v41  ;;  %v3400_v39 = vpack.c.bf16 %v2769_v38, %v2767_v37  ;;  %v2768_v41 = vld [vmem:[%s4215_s3 + $0x30] sm:$0xff] }
 0xd20   :  { %v2461_v43 = vmul.f32 1.442695, %v2459_v42  ;;  %v3402_v42 = vpack.c.bf16 %v2768_v41, %v2766_v40 }
 0xd22   :  { %3520 = vpow2.f32 %v2461_v43  ;;  %v2771_v43 = vld [vmem:[%s4215_s3 + $0x48] sm:$0xff] }
 0xd2c   :  { %v3521_v44 = vpop.eup %3520 }
 0xd2d   :  { %v2465_v46 = vsel %vm333_vm4, %v3521_v44, 0.0 }
 0xd2e   :  { %2466 = vadd.xlane.f32.xlu0 %v2465_v46 }
 0xd5f   :  { %v2445_v47 = vpop.f32.mrb[18].mxu1 }
 0xd60   :  { %v2450_v50 = vmul.f32 0.125, %v2445_v47  ;;  %v3326_v51 = vpop.f32.mrb[19].mxu1  ;;  %v2770_v47 = vld [vmem:[%s4215_s3 + $0x40] sm:$0xff] }
 0xd62   :  { %v2452_v52 = vsel %vm3727_vm3, %v2450_v50, -1e+30  ;;  %v2772_v50 = vld [vmem:[%s4215_s3 + $0x50] sm:$0xff] }
 0xd63   :  { %v2456_v53 = vsel %vm333_vm4, %v2452_v52, -inf  ;;  %v3406_v51 = vpack.c.bf16 %v2772_v50, %v2770_v47 }
 0xd64   :  { %2457 = vmax.xlane.f32.xlu1 %v2456_v53  ;;  %v2777_v53 = vld [vmem:[%s4215_s3 + $0x78] sm:$0xff] }
 0xd75   :  { %2551 = vrot.lane.b32.xlu1 %v3703_v63, %s3578_s22 }
 0xdbb   :  { %v2467_v6 = vpop.xlane.xlu0 %2466 }
 0xdf1   :  { %v2458_v54 = vpop.xlane.xlu1 %2457 }
 0xdf2   :  { %v2460_v55 = vsub.f32 %v2452_v52, %v2458_v54  ;;  %v2775_v52 = vld [vmem:[%s4215_s3 + $0x68] sm:$0xff] }
 0xdf3   :  { %v3408_v54 = vpack.c.bf16 %v2777_v53, %v2775_v52 }
 0xdf4   :  { %v2463_v57 = vmul.f32 1.442695, %v2460_v55  ;;  %v2774_v55 = vld [vmem:[%s4215_s3 + $0x60] sm:$0xff] }
 0xdf5   :  { %v2552_v58 = vpop.permute.xlu1 %2551 }
 0xdf6   :  { %3522 = vpow2.f32 %v2463_v57  ;;  %3333 = vmatpush3.msra.mxu1 %v2552_v58  ;;  %v2776_v57 = vld [vmem:[%s4215_s3 + $0x70] sm:$0xff] }
 0xdf7   :  { %3524 = vrcp.f32 %v2467_v6  ;;  %v3410_v58 = vpack.c.bf16 %v2776_v57, %v2774_v55  ;;  %v2873_v6 = vld [vmem:[%s4216_s4] sm:$0xff] }
 0xe00   :  { %v3523_v59 = vpop.eup %3522 }
 0xe01   :  { %v2468_v60 = vsel %vm333_vm4, %v3523_v59, 0.0  ;;  %v3525_v2 = vpop.eup %3524 }
 0xe02   :  { %2469 = vadd.xlane.f32.xlu0 %v2468_v60  ;;  %v2473_v3 = vmul.f32 %v3525_v2, %v3521_v44  ;;  %v2773_v44 = vld [vmem:[%s4215_s3 + $0x58] sm:$0xff]  ;;  %v2890_v60 = vld [vmem:[%s4216_s4 + $0x88] sm:$0xff] }
 0xe03   :  { %v3404_v46 = vpack.c.bf16 %v2773_v44, %v2771_v43  ;;  %v2874_v2 = vld [vmem:[%s4216_s4 + $0x8] sm:$0xff]  ;;  %v2758_v43 = vsub.s32 3, %v3677_v45 }
 0xe18   :  { %2475 = vrot.lane.b32.xlu0 %v3698_v61, %s3578_s22  ;;  %v3065_v61 = vld [vmem:[%s4214_s2 + $0x50] sm:$0xff] }
 0xe19   :  { %v3390_v7 = vpack.c.bf16 %v3066_v5, %v3065_v61  ;;  %v2875_v61 = vld [vmem:[%s4216_s4 + $0x10] sm:$0xff]  ;;  %v2876_v5 = vld [vmem:[%s4216_s4 + $0x18] sm:$0xff] }
 0xe1b   :  { %3392 = vmatprep.subr.msk.bf16.mxu1 %vm3830_vm7, %v3390_v7 }
 0xe8f   :  { %v2470_v1 = vpop.xlane.xlu0 %2469 }
 0xe90   :  { %3526 = vrcp.f32 %v2470_v1 }
 0xe93   :  { %v2476_v4 = vpop.permute.xlu0 %2475 }
 0xe94   :  { %3328 = vmatpush3.msra.mxu0 %v2476_v4  ;;  %v2892_v4 = vld [vmem:[%s4216_s4 + $0x98] sm:$0xff] }
 0xe95   :  { %3330 = vmatmul.mubr.msk.f32.vlgmr.msra.gmra.mrb[30].mxu0 %vm333_vm4, %v2473_v3  ;;  %3397 = vmatprep.subr.bf16.mxu0 %v3396_v32  ;;  %v2891_v3 = vld [vmem:[%s4216_s4 + $0x90] sm:$0xff]  ;;  %v2902_v32 = vld [vmem:[%s4216_s4 + $0xe8] sm:$0xff] }
 0xe96   :  { %2856 = vmatprep.mubr.f32.mxu0 %v3559_v33  ;;  %3399 = vmatpush1.bf16.msra.mxu0 %v3398_v36  ;;  %v3436_v35 = vpack.c.bf16 %v2902_v32, %v2901_v31 }
 0xe97   :  { %3401 = vmatprep.subr.bf16.mxu0 %v3400_v39 }
 0xe9a   :  { %v3527_v63 = vpop.eup %3526  ;;  %3403 = vmatpush1.bf16.msra.mxu0 %v3402_v42  ;;  %v2752_v42 = vsub.s32 2, %v3677_v45 }
 0xe9b   :  { %v2474_v56 = vmul.f32 %v3527_v63, %v3523_v59  ;;  %3405 = vmatprep.subr.bf16.mxu0 %v3404_v46  ;;  %v2889_v59 = vld [vmem:[%s4216_s4 + $0x80] sm:$0xff]  ;;  %v3414_v63 = vpack.c.bf16 %v2874_v2, %v2873_v6  ;;  %v2888_v2 = vld [vmem:[%s4216_s4 + $0x78] sm:$0xff] }
 0xe9c   :  { %v3412_v1 = vpack.c.bf16 %v2890_v60, %v2889_v59  ;;  %v3534_v46 = vld [vmem:[%s4217_s5] sm:$0xff] }
 0xe9d   :  { %3335 = vmatmul.mubr.msk.f32.vlgmr.msra.gmra.mrb[20].mxu1 %vm333_vm4, %v2474_v56  ;;  %v3416_v56 = vpack.c.bf16 %v2892_v4, %v2891_v3  ;;  %v2753_v47 = vrot.slane %v3534_v46, %v2752_v42  ;;  %v2759_v52 = vrot.slane %v3534_v46, %v2758_v43  ;;  %v2885_v59 = vld [vmem:[%s4216_s4 + $0x60] sm:$0xff]  ;;  %v2780_v4 = vsub.s32 6, %v3677_v45 }
 0xe9e   :  { %3395 = vmatpush3.bf16.msk.msra.mxu1 %vm3830_vm7, %v3390_v7  ;;  %3407 = vmatpush1.bf16.msra.mxu0 %v3406_v51  ;;  %v2893_v7 = vld [vmem:[%s4216_s4 + $0xa0] sm:$0xff] }
 0xe9f   :  { %3409 = vmatprep.subr.bf16.mxu0 %v3408_v54  ;;  %3413 = vmatprep.subr.bf16.mxu1 %v3412_v1  ;;  %v2887_v1 = vld [vmem:[%s4216_s4 + $0x70] sm:$0xff] }
 0xea0   :  { %v3442_v3 = vpack.c.bf16 %v2888_v2, %v2887_v1 }
 0xea2   :  { %3411 = vmatpush1.bf16.msra.mxu0 %v3410_v58 }
 0xf68   :  { %v2547_v8 = vpop.f32.mrb[30].mxu0 }
 0xf69   :  { %v3331_v0 = vpop.f32.mrb[31].mxu0  ;;  %3341 = vmatprep.mubr.msk.f32.mxu1 %vm175_vm2, %v2547_v8  ;;  %v2894_v8 = vld [vmem:[%s4216_s4 + $0xa8] sm:$0xff] }
 0xf6a   :  { %v3418_v0 = vpack.c.bf16 %v2876_v5, %v2875_v61 }
 0xf70   :  { %v2623_v9 = vpop.f32.mrb[20].mxu1 }
 0xf71   :  { %v3336_v10 = vpop.f32.mrb[21].mxu1  ;;  %3342 = vmatmul.mubr.msk.f32.vlgmr.msra.gmra.mrb[8].mxu1 %vm175_vm2, %v2623_v9  ;;  %v3420_v9 = vpack.c.bf16 %v2894_v8, %v2893_v7 }
 0xf72   :  { %3415 = vmatpush3.bf16.msra.mxu1 %v3414_v63  ;;  %v2877_v10 = vld [vmem:[%s4216_s4 + $0x20] sm:$0xff]  ;;  %v27_v63 = vld [vmem:[%s4217_s5 + $0x8] sm:$0xff] }
 0xf73   :  { %3417 = vmatprep.subr.bf16.mxu1 %v3416_v56  ;;  %v2781_v56 = vrot.slane %v3534_v46, %v2780_v4  ;;  %v2785_v61 = vrot.slane %v27_v63, %v2780_v4 }
 0xf76   :  { %3419 = vmatpush3.bf16.msra.mxu1 %v3418_v0 }
 0xf77   :  { %3421 = vmatprep.subr.bf16.mxu1 %v3420_v9 }
0x1044   :  { %v3343_v13 = vpop.f32.mrb[8].mxu1 }
0x1045   :  { %v2717_v15 = vadd.f32 %v3532_v14, %v3343_v13  ;;  %v2705_v49 = vpop.f32.mrb[9].mxu1  ;;  %v2896_v13 = vld [vmem:[%s4216_s4 + $0xb8] sm:$0xff]  ;;  %v3422_v14 = vpack.c.bf16 %v2878_v11, %v2877_v10 }
0x1046   :  { %v2716_v17 = vadd.f32 %v3533_v16, %v2705_v49  ;;  %v2879_v49 = vld [vmem:[%s4216_s4 + $0x30] sm:$0xff]  ;;  %v2880_v16 = vld [vmem:[%s4216_s4 + $0x38] sm:$0xff] }
0x1047   :  { %v4016_v18 = vadd.f32 %v2721_v12, %v2717_v15  ;;  %3423 = vmatpush3.bf16.msra.mxu1 %v3422_v14 }
0x1048   :  { %v4018_v19 = vadd.f32 %v2721_v12, %v2716_v17  ;;  %v2895_v12 = vld [vmem:[%s4216_s4 + $0xb0] sm:$0xff]  ;;  %v2897_v17 = vld [vmem:[%s4216_s4 + $0xc0] sm:$0xff] }
0x1049   :  { %v2727_v20 = vsel %vm28_vm0, %v4016_v18, 0.0  ;;  %v3424_v15 = vpack.c.bf16 %v2896_v13, %v2895_v12 }
0x104a   :  { %2728 = vadd.xlane.f32.xlu0 %v2727_v20  ;;  %v2724_v48 = vsel %vm28_vm0, %v4018_v19, 0.0  ;;  %v2898_v20 = vld [vmem:[%s4216_s4 + $0xc8] sm:$0xff] }
0x104b   :  { %2725 = vadd.xlane.f32.xlu1 %v2724_v48  ;;  %v3426_v48 = vpack.c.bf16 %v2880_v16, %v2879_v49  ;;  %3425 = vmatprep.subr.bf16.mxu1 %v3424_v15  ;;  %v2907_v16 = vsub.s32 5, %v3677_v45 }
0x104d   :  { %3427 = vmatpush3.bf16.msra.mxu1 %v3426_v48 }
0x10d7   :  { %v2729_v21 = vpop.xlane.xlu0 %2728 }
0x10d8   :  { %v2731_v62 = vmul.f32 0.015625, %v2729_v21  ;;  %v2726_v22 = vpop.xlane.xlu1 %2725  ;;  %v3428_v21 = vpack.c.bf16 %v2898_v20, %v2897_v17  ;;  %v2908_v20 = vrot.slane %v3534_v46, %v2907_v16 }
0x10d9   :  { %v2730_v23 = vmul.f32 0.015625, %v2726_v22  ;;  %v2882_v22 = vld [vmem:[%s4216_s4 + $0x48] sm:$0xff] }
0x10da   :  { %v4025_v24 = vsub.f32 %v4016_v18, %v2731_v62  ;;  %v2881_v62 = vld [vmem:[%s4216_s4 + $0x40] sm:$0xff]  ;;  %3429 = vmatprep.subr.bf16.mxu1 %v3428_v21 }
0x10db   :  { %v4028_v25 = vsub.f32 %v4018_v19, %v2730_v23  ;;  %v2899_v23 = vld [vmem:[%s4216_s4 + $0xd0] sm:$0xff] }
0x10dc   :  { %v2735_v26 = vmul.f32 %v4025_v24, %v4025_v24 }
0x10dd   :  { %v2734_v27 = vmul.f32 %v4028_v25, %v4028_v25 }
0x10de   :  { %v2739_v28 = vsel %vm28_vm0, %v2735_v26, 0.0  ;;  %v2900_v26 = vld [vmem:[%s4216_s4 + $0xd8] sm:$0xff] }
0x10df   :  { %2740 = vadd.xlane.f32.xlu1 %v2739_v28  ;;  %v2736_v29 = vsel %vm28_vm0, %v2734_v27, 0.0  ;;  %v3430_v27 = vpack.c.bf16 %v2882_v22, %v2881_v62  ;;  %v3432_v28 = vpack.c.bf16 %v2900_v26, %v2899_v23 }
0x10e0   :  { %2737 = vadd.xlane.f32.xlu0 %v2736_v29  ;;  %v2883_v29 = vld [vmem:[%s4216_s4 + $0x50] sm:$0xff] }
0x10e1   :  { %3431 = vmatpush3.bf16.msra.mxu1 %v3430_v27  ;;  %v3434_v34 = vpack.c.bf16 %v2884_v30, %v2883_v29 }
0x10e2   :  { %3433 = vmatprep.subr.bf16.mxu1 %v3432_v28 }
0x10e5   :  { %3435 = vmatpush3.bf16.msra.mxu1 %v3434_v34 }
0x10e6   :  { %3437 = vmatprep.subr.bf16.mxu1 %v3436_v35 }
0x116c   :  { %v2741_v36 = vpop.xlane.xlu1 %2740 }
0x116d   :  { %v2743_v37 = vmul.f32 0.015625, %v2741_v36  ;;  %v2738_v38 = vpop.xlane.xlu0 %2737 }
0x116e   :  { %v2742_v39 = vmul.f32 0.015625, %v2738_v38 }
0x116f   :  { %v2745_v40 = vadd.f32 1e-05, %v2743_v37 }
0x1170   :  { %v2744_v41 = vadd.f32 1e-05, %v2742_v39 }
0x1171   :  { %3528 = vrsqrt.f32 %v2745_v40 }
0x1172   :  { %3530 = vrsqrt.f32 %v2744_v41 }
0x117b   :  { %v3529_v44 = vpop.eup %3528 }
0x117c   :  { %v3531_v50 = vpop.eup %3530  ;;  %v2749_v53 = vmul.f32 %v3529_v44, %v4025_v24  ;;  %v2903_v24 = vld [vmem:[%s4216_s4 + $0xf0] sm:$0xff] }
0x117d   :  { %v2748_v51 = vmul.f32 %v3531_v50, %v4028_v25  ;;  %v2886_v25 = vld [vmem:[%s4216_s4 + $0x68] sm:$0xff] }
0x117e   :  { %v2755_v57 = vmul.f32 %v2753_v47, %v2749_v53  ;;  %v3438_v60 = vpack.c.bf16 %v2886_v25, %v2885_v59 }
0x117f   :  { %v2754_v54 = vmul.f32 %v2753_v47, %v2748_v51 }
0x1180   :  { %v2761_v58 = vadd.f32 %v2759_v52, %v2755_v57  ;;  %3439 = vmatpush3.bf16.msra.mxu1 %v3438_v60 }
0x1181   :  { %v2760_v55 = vadd.f32 %v2759_v52, %v2754_v54 }
0x1183   :  { %3070 = vmatmul.mubr.msk.f32.vlgmr.msra.gmra.mrb[32].mxu0 %vm28_vm0, %v2760_v55 }
0x1184   :  { %2862 = vmatprep.mubr.f32.mxu0 %v3559_v33  ;;  %v2904_v33 = vld [vmem:[%s4216_s4 + $0xf8] sm:$0xff]  ;;  %s3579_s4 = smov [#allocation2]  }
0x1185   :  { %v3440_v6 = vpack.c.bf16 %v2904_v33, %v2903_v24  ;;  %s2993_s5 = sshll.u32 %s3579_s4, 4  ;;  %s2994_s5 = int_to_ptr.vmem [resolvable:$true] %s2993_s5 }
0x1186   :  { %s3535_s24 = scalar_lea.vmem %s2994_s5, 256  ;;  %p3540_p1 = scmp.lt.s32.totalorder %s2994_s5, %s2994_s5 }
0x1187   :  { %3071 = vmatmul.mubr.msk.f32.gmra.mrb[34].mxu0 %vm28_vm0, %v2761_v58  ;;  %3441 = vmatprep.subr.bf16.mxu1 %v3440_v6  ;;  %p3536_p0 = scmp.ne.s32.totalorder %s2994_s5, %s3535_s24  ;;  %p3541_p2 = scmp.lt.s32.totalorder %s3535_s24, %s3535_s24 }
0x1188   :  { %3443 = vmatpush3.bf16.msra.mxu1 %v3442_v3 }
0x1189   :  { %p3542_p3 = por %p3541_p2, %p3540_p1 }
0x118b   :  { %p3543_p4 = pnand %p3542_p3, %p3536_p0 }
0x1256   :  { %v2858_v5 = vpop.f32.mrb[32].mxu0 }
0x1257   :  { %v2859_v7 = vadd.f32 %v2858_v5, %v2781_v56  ;;  %v2860_v8 = vpop.f32.mrb[33].mxu0 }
0x1258   :  { %v2861_v0 = vadd.f32 %v2860_v8, %v2785_v61 }
0x1259   :  { %v2869_v11 = vmax.f32 %v2859_v7, 0.0 }
0x125a   :  { %v2870_v9 = vmax.f32 %v2861_v0, 0.0  ;;  %v2864_v10 = vpop.f32.mrb[34].mxu0 }
0x125b   :  { %v2865_v12 = vadd.f32 %v2864_v10, %v2781_v56  ;;  %v2866_v13 = vpop.f32.mrb[35].mxu0 }
0x125c   :  { %v2867_v14 = vadd.f32 %v2866_v13, %v2785_v61  ;;  %2973 = vmatprep.mubr.f32.mxu1 %v2870_v9 }
0x125d   :  { %2974 = vmatmul.mubr.f32.vlgmr.msra.gmra.mrb[22].mxu1 %v2869_v11  ;;  %v2871_v49 = vmax.f32 %v2865_v12, 0.0 }
0x125e   :  { %v2872_v15 = vmax.f32 %v2867_v14, 0.0 }
0x1260   :  { %2978 = vmatprep.mubr.f32.mxu1 %v2872_v15 }
0x1261   :  { %2979 = vmatmul.mubr.f32.gmra.mrb[24].mxu1 %v2871_v49 }
0x1330   :  { %v3176_v17 = vpop.f32.mrb[22].mxu1 }
0x1331   :  { %v3177_v48 = vpop.f32.mrb[23].mxu1 }
0x1332   :  { %v3178_v21 = vadd.f32 %v3177_v48, %v3176_v17 }
0x1334   :  { %v2976_v62 = vadd.f32 %v3178_v21, %v2908_v20  ;;  %v3179_v22 = vpop.f32.mrb[24].mxu1 }
0x1335   :  { %v3180_v23 = vpop.f32.mrb[25].mxu1 }
0x1336   :  { %v2984_v26 = vadd.f32 %v2976_v62, %v4018_v19  ;;  %v3181_v27 = vadd.f32 %v3180_v23, %v3179_v22 }
0x1338   :  { %2986 = vst.msk [vmem:[#allocation2] sm:$0xff] %vm28_vm0, %v2984_v26  ;;  %v2981_v28 = vadd.f32 %v3181_v27, %v2908_v20 }
0x133a   :  { %v2985_v29 = vadd.f32 %v2981_v28, %v4016_v18 }
0x133c   :  { %2987 = vst.msk [vmem:[#allocation2 + $0x8] sm:$0xff] %vm28_vm0, %v2985_v29 }
0x133d   :  { %3546 = shalt.err (!%p3543_p4)
}
0x133e   :  { %s3547_s2 = scalar_lea.hbm %s4218_s6, 256 }
0x133f   :  { %p3548_p5 = scmp.ne.s32.totalorder %s4218_s6, %s3547_s2  ;;  %p3551_p6 = scmp.lt.u32.totalorder %s3547_s2, %s4218_s6 }
0x1341   :  { %p3553_p7 = pnand %p3551_p6, %p3548_p5 }
0x1343   :  { %3556 = shalt.err (!%p3553_p7)
}
0x1344   :  { %s3580_s30 = smov 128  }
0x1345   :  { %2999 = dma.vmem_to_hbm [thread:$0]  %s2994_s5, 256, %s4218_s6, [#allocation3], %s3580_s30, %s3580_s30, %s3564_s13  }
0x1346   :  { %3557 = dma.done.wait [#allocation3], 256  }
0x1347   :  { %3558 = vsyncadd [#allocation3], 4294967040 }
0x1348   :  { %3003 = vsyncpa [#allocation3], 1 }

</bundles_post_ra>
